<compile_context>
chip_gen: v5e
topology: v5e:2x2
jax: 0.10.0
libtpu: 0.0.40
codegen_flags: <defaults>
</compile_context>

<pallas_src>
import jax
import jax.numpy as jnp
from jax.experimental import pallas as pl
from jax.experimental.pallas import tpu as pltpu


def _temp_scale_head_kernel(t_ref, x_ref, w_ref, b_ref, o_ref):
    # t_ref: SMEM (1,)          temperature parameter
    # x_ref: VMEM (TB, C*HW)    batch tile of flattened input (native dtype)
    # w_ref: VMEM (C*HW, Kp)    pooling-fused classifier weight (W/HW repeated)
    # b_ref: VMEM (1, Kp)       zero-padded classifier bias
    # o_ref: VMEM (TB, Kp)      temperature-scaled logits
    logits = jnp.dot(
        x_ref[...], w_ref[...],
        precision=jax.lax.Precision.HIGHEST,       # full-f32 MXU accumulation
        preferred_element_type=jnp.float32,
    )
    logits = logits + b_ref[...]
    # Single scalar per grid step, off the critical path -> exact reciprocal
    # keeps the 1e-5 numerical check tight at zero measurable cost.
    inv_t = 1.0 / t_ref[0]
    o_ref[...] = (logits * inv_t).astype(o_ref.dtype)


def model_with_temperature_forward(x_nchw, weight, bias, temperature):
    """x_nchw: [B, C, H, W]; weight: [C, K]; bias: [K]; temperature: [1]."""
    B, C, H, W = x_nchw.shape
    HW = H * W
    CHW = C * HW
    K = weight.shape[1]
    Kp = ((K + 127) // 128) * 128                  # lane-dense output width

    # Stream x in its native dtype (no wrapper upcast); 2-D lane-major layout.
    x2d = x_nchw.reshape(B, CHW)

    # Fuse global-average-pool into the classifier weight (done once, tiny).
    w_rep = jnp.repeat(weight.astype(jnp.float32), HW, axis=0) / float(HW)
    w_rep = jnp.pad(w_rep, ((0, 0), (0, Kp - K)))
    bias2d = jnp.pad(bias.astype(jnp.float32).reshape(1, K),
                     ((0, 0), (0, Kp - K)))
    temp = temperature.reshape(1).astype(jnp.float32)

    # --- batch tile sized against the smallest per-generation VMEM (v7x 64MiB)
    itemsize = jnp.dtype(x2d.dtype).itemsize
    row_bytes = CHW * itemsize + Kp * 4            # x row + out row per batch
    w_bytes = CHW * Kp * 4
    avail = max(8 << 20, (40 << 20) - 2 * (w_bytes + Kp * 4))
    tb = max(1, min(B, avail // (2 * row_bytes), 512))
    if tb < B:
        tb = max(8, (tb // 8) * 8)                 # keep sublane dim % 8 == 0
    nb = pl.cdiv(B, tb)
    B_pad = nb * tb
    if B_pad != B:
        x2d = jnp.pad(x2d, ((0, B_pad - B), (0, 0)))

    est_vmem = 2 * tb * row_bytes + 2 * (w_bytes + Kp * 4)
    vmem_limit = int(min(max(est_vmem + (4 << 20), 32 << 20), 48 << 20))

    cost = pl.CostEstimate(
        flops=2 * B_pad * CHW * Kp,
        transcendentals=0,
        bytes_accessed=(x2d.size * itemsize + w_rep.size * 4
                        + bias2d.size * 4 + B_pad * Kp * 4),
    )

    out = pl.pallas_call(
        _temp_scale_head_kernel,
        out_shape=jax.ShapeDtypeStruct((B_pad, Kp), jnp.float32),
        grid=(nb,),
        in_specs=[
            pl.BlockSpec(memory_space=pltpu.SMEM),        # temperature scalar
            pl.BlockSpec((tb, CHW), lambda i: (i, 0)),    # batch tile of x
            pl.BlockSpec((CHW, Kp), lambda i: (0, 0)),    # resident fused weight
            pl.BlockSpec((1, Kp), lambda i: (0, 0)),      # resident bias
        ],
        out_specs=pl.BlockSpec((tb, Kp), lambda i: (i, 0)),
        compiler_params=pltpu.CompilerParams(
            dimension_semantics=("parallel",),
            vmem_limit_bytes=vmem_limit),
        cost_estimate=cost,
    )(temp, x2d, w_rep, bias2d)

    return out[:B, :K]


def reference_forward(x_nchw, weight, bias, temperature):
    """Pure-JAX reference mirroring the PyTorch semantics (f32 math)."""
    B, C, H, W = x_nchw.shape
    pooled = jnp.mean(x_nchw.reshape(B, C, H * W).astype(jnp.float32), axis=-1)
    logits = jnp.dot(pooled, weight.astype(jnp.float32),
                     precision=jax.lax.Precision.HIGHEST) + bias
    # temperature.unsqueeze(1).expand(B, K) -> broadcast scalar divide
    return logits / temperature.reshape(1, 1)


if __name__ == "__main__":
    # Small deterministic shapes: batch=2, channels=4, spatial=16x16, classes=10
    B, C, H, W, K = 2, 4, 16, 16, 10
    key = jax.random.PRNGKey(0)
    kx, kw, kb = jax.random.split(key, 3)

    x = jax.random.normal(kx, (B, C, H, W), dtype=jnp.float32)
    weight = jax.random.normal(kw, (C, K), dtype=jnp.float32) * 0.1
    bias = jax.random.normal(kb, (K,), dtype=jnp.float32) * 0.01
    # nn.Parameter(torch.ones(1) * 1.5)
    temperature = jnp.ones((1,), dtype=jnp.float32) * 1.5

    out = model_with_temperature_forward(x, weight, bias, temperature)
    out = jax.block_until_ready(out)

    ref = reference_forward(x, weight, bias, temperature)
    assert out.shape == (B, K)
    assert jnp.allclose(out, ref, atol=1e-5, rtol=1e-5), "mismatch vs reference"

    # TODO(synk): set_temperature (LBFGS fitting) and _ECELoss are host-side
    # calibration-time utilities with data-dependent control flow, not part of
    # the forward pass; not implemented as kernels.
    print("KERNEL_OK")
</pallas_src>

<mosaic_0001>
module attributes {stable_mosaic.version = 11 : i64} {
  func.func @_temp_scale_head_kernel(%arg0: i32, %arg1: memref<1xf32, #tpu.memory_space<smem>>, %arg2: memref<2x1024xf32, #tpu.memory_space<vmem>>, %arg3: memref<1024x128xf32, #tpu.memory_space<vmem>>, %arg4: memref<1x128xf32, #tpu.memory_space<vmem>>, %arg5: memref<2x128xf32, #tpu.memory_space<vmem>>) attributes {dimension_semantics = [#tpu.dimension_semantics<parallel>], iteration_bounds = array<i64: 1>, scalar_prefetch = 0 : i64, scratch_operands = 0 : i64, tpu.core_type = #tpu.core_type<tc>, window_params = [{transform_indices = @transform_0, window_bounds = array<i64: 1>}, {transform_indices = @transform_1, window_bounds = array<i64: 2, 1024>}, {pipeline_mode = #tpu.pipeline_mode<synchronous>, transform_indices = @transform_2, window_bounds = array<i64: 1024, 128>}, {pipeline_mode = #tpu.pipeline_mode<synchronous>, transform_indices = @transform_3, window_bounds = array<i64: 1, 128>}, {transform_indices = @transform_4, window_bounds = array<i64: 2, 128>}]} {
    %c0 = arith.constant 0 : index
    %c0_0 = arith.constant 0 : index
    %0 = vector.load %arg2[%c0, %c0_0] : memref<2x1024xf32, #tpu.memory_space<vmem>>, vector<2x1024xf32>
    %c0_1 = arith.constant 0 : index
    %c0_2 = arith.constant 0 : index
    %1 = vector.load %arg3[%c0_1, %c0_2] : memref<1024x128xf32, #tpu.memory_space<vmem>>, vector<1024x128xf32>
    %cst = arith.constant dense<0.000000e+00> : vector<2x128xf32>
    %2 = tpu.matmul %0, %1, %cst {dimension_numbers = #tpu.dot_dimension_numbers<[1], [0], [0], [1], [0, 0, 1, 1], [], []>, precision = #tpu.contract_precision<fp32>} : vector<2x1024xf32>, vector<1024x128xf32>, vector<2x128xf32> -> vector<2x128xf32>
    %c0_3 = arith.constant 0 : index
    %c0_4 = arith.constant 0 : index
    %3 = vector.load %arg4[%c0_3, %c0_4] : memref<1x128xf32, #tpu.memory_space<vmem>>, vector<1x128xf32>
    %4 = vector.broadcast %3 : vector<1x128xf32> to vector<2x128xf32>
    %5 = arith.addf %2, %4 : vector<2x128xf32>
    %c0_5 = arith.constant 0 : index
    %6 = memref.load %arg1[%c0_5] : memref<1xf32, #tpu.memory_space<smem>>
    %cst_6 = arith.constant 1.000000e+00 : f32
    %7 = arith.divf %cst_6, %6 : f32
    %8 = vector.broadcast %7 : f32 to vector<2x128xf32>
    %9 = arith.mulf %5, %8 : vector<2x128xf32>
    %c0_7 = arith.constant 0 : index
    %c0_8 = arith.constant 0 : index
    %10 = vector.load %arg5[%c0_7, %c0_8] : memref<2x128xf32, #tpu.memory_space<vmem>>, vector<2x128xf32>
    tpu.vector_store %arg5[%c0_7, %c0_8], %9 {strides = array<i32>} : memref<2x128xf32, #tpu.memory_space<vmem>>, vector<2x128xf32>,
    return
  }
  func.func @transform_0(%arg0: i32) -> i32 {
    %c0_i32 = arith.constant 0 : i32
    %c0_i32_0 = arith.constant 0 : i32
    return %c0_i32 : i32
  }
  func.func @transform_1(%arg0: i32) -> (i32, i32) {
    %c0_i32 = arith.constant 0 : i32
    %c0_i32_0 = arith.constant 0 : i32
    return %arg0, %c0_i32 : i32, i32
  }
  func.func @transform_2(%arg0: i32) -> (i32, i32) {
    %c0_i32 = arith.constant 0 : i32
    %c0_i32_0 = arith.constant 0 : i32
    %c0_i32_1 = arith.constant 0 : i32
    return %c0_i32, %c0_i32_0 : i32, i32
  }
  func.func @transform_3(%arg0: i32) -> (i32, i32) {
    %c0_i32 = arith.constant 0 : i32
    %c0_i32_0 = arith.constant 0 : i32
    %c0_i32_1 = arith.constant 0 : i32
    return %c0_i32, %c0_i32_0 : i32, i32
  }
  func.func @transform_4(%arg0: i32) -> (i32, i32) {
    %c0_i32 = arith.constant 0 : i32
    %c0_i32_0 = arith.constant 0 : i32
    return %arg0, %c0_i32 : i32, i32
  }
}

</mosaic_0001>

<bundles_post_ra>
// kernel: tpu_custom_call.1
= control target key start
LH: loop header
LB: loop body
LE: loop exit
PB: predicated region body
PF: predicated region fallthrough
CT: control target
= control target key end

     0   :  { %10 = vsyncpa [#allocation4], 0  ;;  %s5139_s0 = inlined_call_operand.<no memory space> [shape: f32[1], index: 0, kind: input, shape index: {}]   ;;  %s5140_s1 = inlined_call_operand.hbm [shape: f32[2,1024], index: 1, kind: input, shape index: {}]   ;;  %s5141_s2 = inlined_call_operand.hbm [shape: f32[1024,128], index: 2, kind: input, shape index: {}]   ;;  %s5142_s3 = inlined_call_operand.vmem [shape: f32[1,128], index: 3, kind: input, shape index: {}]   ;;  %s5143_s4 = inlined_call_operand.hbm [shape: f32[2,128], index: 4, kind: output, shape index: {}]  }
   0x1   :  { %11 = vsyncpa [#allocation7], 0 }
   0x2   :  { %12 = vsyncpa [#allocation5], 0  ;;  %s20_s17 = sshll.u32 %s5140_s1, 4  ;;  %s3058_s18 = smov [#allocation3]   ;;  %s21_s17 = int_to_ptr.hbm [resolvable:$true] %s20_s17 }
   0x3   :  { %s22_s19 = sshll.u32 %s3058_s18, 4  ;;  %s30_s22 = sshll.u32 %s5141_s2, 4  ;;  %s23_s19 = int_to_ptr.vmem [resolvable:$true] %s22_s19  ;;  %s31_s22 = int_to_ptr.hbm [resolvable:$true] %s30_s22 }
   0x4   :  { %25 = dma.hbm_to_vmem [thread:$0]  %s21_s17, 256, %s23_s19, [#allocation4]  }
   0x5   :  { %s3059_s23 = smov [#allocation6]   ;;  %s3060_s25 = smov 128  }
   0x6   :  { %s32_s24 = sshll.u32 %s3059_s23, 4  ;;  %s3061_s26 = smov 8   ;;  %s33_s24 = int_to_ptr.vmem [resolvable:$true] %s32_s24 }
   0x7   :  { %38 = dma.hbm_to_vmem [thread:$0]  %s31_s22, 16384, %s33_s24, [#allocation7], %s3060_s25, %s3060_s25, %s3061_s26  }
   0x8   :  { %3052 = dma.done.wait [#allocation4], 256  }
   0x9   :  { %3053 = vsyncadd [#allocation4], 4294967040 }
   0xa   :  { %3054 = dma.done.wait [#allocation7], 16384  }
   0xb   :  { %3055 = vsyncadd [#allocation7], 4294950912  ;;  %v66_v0 = vld [vmem:[#allocation6 + $0x78] sm:$0xff]  ;;  %v65_v1 = vld [vmem:[#allocation6 + $0x70] sm:$0xff]  ;;  %s3062_s28 = smov [#allocation8]   ;;  %s2959_s6 = sshll.u32 %s5143_s4, 4  ;;  %s2960_s6 = int_to_ptr.hbm [resolvable:$true] %s2959_s6 }
   0xc   :  { %v64_v2 = vld [vmem:[#allocation6 + $0x68] sm:$0xff]  ;;  %v3094_v3 = vand.u32 4294901760, %v66_v0  ;;  %v3096_v4 = vand.u32 4294901760, %v65_v1  ;;  %v63_v6 = vld [vmem:[#allocation6 + $0x60] sm:$0xff]  ;;  %v62_v7 = vld [vmem:[#allocation6 + $0x58] sm:$0xff]  ;;  %s2957_s29 = sshll.u32 %s3062_s28, 4  ;;  %s2958_s29 = int_to_ptr.vmem [resolvable:$true] %s2957_s29 }
   0xd   :  { %v3098_v5 = vand.u32 4294901760, %v64_v2  ;;  %v61_v8 = vld [vmem:[#allocation6 + $0x50] sm:$0xff]  ;;  %v3100_v9 = vand.u32 4294901760, %v63_v6  ;;  %v3102_v10 = vand.u32 4294901760, %v62_v7  ;;  %v60_v12 = vld [vmem:[#allocation6 + $0x48] sm:$0xff]  ;;  %v59_v13 = vld [vmem:[#allocation6 + $0x40] sm:$0xff] }
   0xe   :  { %v3104_v11 = vand.u32 4294901760, %v61_v8  ;;  %205 = vmatpush.msra.mxu0 %v3094_v3  ;;  %v3108_v14 = vsub.f32 %v66_v0, %v3094_v3  ;;  %v3111_v15 = vsub.f32 %v65_v1, %v3096_v4  ;;  %401 = vmatpush.msra.mxu3 %v3094_v3  ;;  %v3117_v17 = vand.u32 4294901760, %v60_v12  ;;  %v58_v21 = vld [vmem:[#allocation6 + $0x38] sm:$0xff]  ;;  %v57_v26 = vld [vmem:[#allocation6 + $0x30] sm:$0xff]  ;;  %v56_v36 = vld [vmem:[#allocation6 + $0x28] sm:$0xff] }
   0xf   :  { %v3115_v16 = vsub.f32 %v64_v2, %v3098_v5  ;;  %v3120_v18 = vsub.f32 %v63_v6, %v3100_v9  ;;  %v3123_v19 = vsub.f32 %v62_v7, %v3102_v10  ;;  %v3133_v25 = vand.u32 4294901760, %v59_v13  ;;  %v55_v42 = vld [vmem:[#allocation6 + $0x20] sm:$0xff]  ;;  %v54_v47 = vld [vmem:[#allocation6 + $0x18] sm:$0xff]  ;;  %v53_v54 = vld [vmem:[#allocation6 + $0x10] sm:$0xff] }
  0x10   :  { %v3126_v20 = vsub.f32 %v61_v8, %v3104_v11  ;;  %207 = vmatpush.msra.mxu0 %v3096_v4  ;;  %348 = vmatpush.msra.mxu2 %v3108_v14  ;;  %v247_v22 = vand.u32 4294901760, %v3108_v14  ;;  %v5159_v23 = vand.u32 4294901760, %v3111_v15  ;;  %v3139_v29 = vsub.f32 %v60_v12, %v3117_v17  ;;  %v49_v55 = vld [vmem:[#allocation3] sm:$0xff]  ;;  %v82_v60 = vld [vmem:[#allocation6 + $0xf8] sm:$0xff]  ;;  %v52_v62 = vld [vmem:[#allocation6 + $0x8] sm:$0xff] }
  0x11   :  { %v5157_v24 = vand.u32 4294901760, %v3115_v16  ;;  %403 = vmatpush.msra.mxu3 %v3096_v4  ;;  %v5156_v27 = vand.u32 4294901760, %v3120_v18  ;;  %v5153_v28 = vand.u32 4294901760, %v3123_v19  ;;  %v3152_v33 = vand.u32 4294901760, %v58_v21  ;;  %185 = vst [vmem:[#allocation1] ss:$4 sm:$0xff] %v49_v55 }
  0x12   :  { %209 = vmatpush.msra.mxu0 %v3098_v5  ;;  %351 = vmatpush.msra.mxu2 %v3111_v15  ;;  %v248_v30 = vsub.f32 %v3108_v14, %v247_v22  ;;  %v254_v31 = vsub.f32 %v3111_v15, %v5159_v23  ;;  %v3155_v34 = vand.u32 4294901760, %v57_v26  ;;  %v5151_v35 = vand.u32 4294901760, %v3126_v20  ;;  %v51_v6 = vld [vmem:[#allocation6] sm:$0xff]  ;;  %v81_v7 = vld [vmem:[#allocation6 + $0xf0] sm:$0xff] }
  0x13   :  { %v260_v32 = vsub.f32 %v3115_v16, %v5157_v24  ;;  %405 = vmatpush.msra.mxu3 %v3098_v5  ;;  %v266_v39 = vsub.f32 %v3120_v18, %v5156_v27  ;;  %v3164_v40 = vsub.f32 %v59_v13, %v3133_v25  ;;  %v272_v41 = vsub.f32 %v3123_v19, %v5153_v28 }
  0x14   :  { %211 = vmatpush.msra.mxu0 %v3100_v9  ;;  %v249_v37 = vand.u32 4294901760, %v248_v30  ;;  %354 = vmatpush.msra.mxu2 %v3115_v16  ;;  %v255_v38 = vand.u32 4294901760, %v254_v31  ;;  %v3171_v44 = vand.u32 4294901760, %v56_v36  ;;  %v5150_v45 = vand.u32 4294901760, %v3139_v29 }
  0x15   :  { %407 = vmatpush.msra.mxu3 %v3100_v9  ;;  %v261_v43 = vand.u32 4294901760, %v260_v32  ;;  %v3175_v46 = vsub.f32 %v58_v21, %v3152_v33  ;;  %v278_v48 = vsub.f32 %v3126_v20, %v5151_v35  ;;  %v267_v49 = vand.u32 4294901760, %v266_v39 }
  0x16   :  { %213 = vmatpush.msra.mxu0 %v3102_v10  ;;  %250 = vmatpush.msra.mxu1 %v249_v37  ;;  %v3183_v50 = vand.u32 4294901760, %v55_v42  ;;  %v5149_v51 = vand.u32 4294901760, %v3164_v40  ;;  %v3187_v52 = vsub.f32 %v57_v26, %v3155_v34  ;;  %v3191_v53 = vand.u32 4294901760, %v54_v47 }
  0x17   :  { %357 = vmatpush.msra.mxu2 %v3120_v18  ;;  %409 = vmatpush.msra.mxu3 %v3102_v10  ;;  %v273_v56 = vand.u32 4294901760, %v272_v41  ;;  %v284_v57 = vsub.f32 %v3139_v29, %v5150_v45  ;;  %v5148_v58 = vand.u32 4294901760, %v3175_v46  ;;  %v3199_v59 = vsub.f32 %v56_v36, %v3171_v44  ;;  %v80_v36 = vld [vmem:[#allocation6 + $0xe8] sm:$0xff]  ;;  %v75_v45 = vld [vmem:[#allocation6 + $0xc0] sm:$0xff] }
  0x18   :  { %215 = vmatpush.msra.mxu0 %v3104_v11  ;;  %256 = vmatpush.msra.mxu1 %v255_v38  ;;  %v279_v61 = vand.u32 4294901760, %v278_v48  ;;  %v290_v63 = vsub.f32 %v3164_v40, %v5149_v51  ;;  %v3207_v0 = vand.u32 4294901760, %v53_v54  ;;  %v5147_v1 = vand.u32 4294901760, %v3187_v52 }
  0x19   :  { %360 = vmatpush.msra.mxu2 %v3123_v19  ;;  %411 = vmatpush.msra.mxu3 %v3104_v11  ;;  %v3211_v2 = vsub.f32 %v55_v42, %v3183_v50  ;;  %v3216_v8 = vsub.f32 %v54_v47, %v3191_v53  ;;  %v3218_v12 = vand.u32 4294901760, %v82_v60  ;;  %v285_v13 = vand.u32 4294901760, %v284_v57  ;;  %v79_v47 = vld [vmem:[#allocation6 + $0xe0] sm:$0xff] }
  0x1a   :  { %217 = vmatpush.msra.mxu0 %v3117_v17  ;;  %262 = vmatpush.msra.mxu1 %v261_v43  ;;  %v296_v21 = vsub.f32 %v3175_v46, %v5148_v58  ;;  %v3224_v26 = vand.u32 4294901760, %v52_v62  ;;  %v5145_v30 = vand.u32 4294901760, %v3199_v59  ;;  %v3229_v31 = vand.u32 4294901760, %v51_v6  ;;  %v76_v58 = vld [vmem:[#allocation6 + $0xc8] sm:$0xff] }
  0x1b   :  { %363 = vmatpush.msra.mxu2 %v3126_v20  ;;  %413 = vmatpush.msra.mxu3 %v3117_v17  ;;  %v3231_v32 = vand.u32 4294901760, %v81_v7  ;;  %v291_v37 = vand.u32 4294901760, %v290_v63  ;;  %v302_v38 = vsub.f32 %v3187_v52, %v5147_v1  ;;  %v5144_v39 = vand.u32 4294901760, %v3211_v2 }
  0x1c   :  { %219 = vmatpush.msra.mxu0 %v3133_v25  ;;  %268 = vmatpush.msra.mxu1 %v267_v49  ;;  %5222 = vst [vmem:[#allocation12_spill] sm:$0xff] %v3229_v31  ;;  %v3239_v41 = vsub.f32 %v53_v54, %v3207_v0  ;;  %v5146_v42 = vand.u32 4294901760, %v3216_v8  ;;  %v3245_v43 = vsub.f32 %v82_v60, %v3218_v12  ;;  %v297_v48 = vand.u32 4294901760, %v296_v21  ;;  %v78_v60 = vld [vmem:[#allocation6 + $0xd8] sm:$0xff]  ;;  %v77_v21 = vld [vmem:[#allocation6 + $0xd0] sm:$0xff] }
  0x1d   :  { %366 = vmatpush.msra.mxu2 %v3139_v29  ;;  %415 = vmatpush.msra.mxu3 %v3133_v25  ;;  %v308_v49 = vsub.f32 %v3199_v59, %v5145_v30  ;;  %v3252_v54 = vsub.f32 %v52_v62, %v3224_v26  ;;  %v3254_v55 = vand.u32 4294901760, %v80_v36  ;;  %v3262_v57 = vsub.f32 %v81_v7, %v3231_v32 }
  0x1e   :  { %221 = vmatpush.msra.mxu0 %v3152_v33  ;;  %274 = vmatpush.msra.mxu1 %v273_v56  ;;  %v3259_v56 = vsub.f32 %v51_v6, %v3229_v31  ;;  %v314_v62 = vsub.f32 %v3211_v2, %v5144_v39  ;;  %v5152_v63 = vand.u32 4294901760, %v3239_v41  ;;  %v320_v6 = vsub.f32 %v3216_v8, %v5146_v42 }
  0x1f   :  { %369 = vmatpush.msra.mxu2 %v3164_v40  ;;  %417 = vmatpush.msra.mxu3 %v3152_v33  ;;  %v5154_v7 = vand.u32 4294901760, %v3245_v43  ;;  %v3280_v39 = vsub.f32 %v80_v36, %v3254_v55  ;;  %v3282_v30 = vand.u32 4294901760, %v78_v60  ;;  %v5158_v1 = vand.u32 4294901760, %v3262_v57 }
  0x20   :  { %223 = vmatpush.msra.mxu0 %v3155_v34  ;;  %280 = vmatpush.msra.mxu1 %v279_v61  ;;  %v303_v61 = vand.u32 4294901760, %v302_v38  ;;  %v5155_v38 = vand.u32 4294901760, %v3252_v54  ;;  %v5160_v42 = vand.u32 4294901760, %v3259_v56  ;;  %v326_v36 = vsub.f32 %v3239_v41, %v5152_v63 }
  0x21   :  { %372 = vmatpush.msra.mxu2 %v3175_v46  ;;  %419 = vmatpush.msra.mxu3 %v3155_v34  ;;  %v3295_v51 = vand.u32 4294901760, %v77_v21  ;;  %v321_v35 = vand.u32 4294901760, %v320_v6  ;;  %v3308_v63 = vsub.f32 %v78_v60, %v3282_v30  ;;  %v3310_v28 = vand.u32 4294901760, %v76_v58  ;;  %v74_v6 = vld [vmem:[#allocation6 + $0xb8] sm:$0xff] }
  0x22   :  { %225 = vmatpush.msra.mxu0 %v3171_v44  ;;  %286 = vmatpush.msra.mxu1 %v285_v13  ;;  %v3269_v13 = vand.u32 4294901760, %v79_v47  ;;  %v338_v60 = vsub.f32 %v3259_v56, %v5160_v42  ;;  %v3330_v23 = vand.u32 4294901760, %v74_v6  ;;  %v5224_v14 = vand.u32 4294901760, %v3111_v15 }
  0x23   :  { %375 = vmatpush.msra.mxu2 %v3187_v52  ;;  %421 = vmatpush.msra.mxu3 %v3171_v44  ;;  %v3325_v24 = vsub.f32 %v77_v21, %v3295_v51  ;;  %v3338_v27 = vsub.f32 %v76_v58, %v3310_v28  ;;  %v5226_v15 = vand.u32 4294901760, %v3115_v16  ;;  %v5228_v16 = vand.u32 4294901760, %v3120_v18 }
  0x24   :  { %227 = vmatpush.msra.mxu0 %v3183_v50  ;;  %292 = vmatpush.msra.mxu1 %v291_v37  ;;  %v309_v37 = vand.u32 4294901760, %v308_v49  ;;  %v3293_v49 = vsub.f32 %v79_v47, %v3269_v13  ;;  %v332_v47 = vsub.f32 %v3252_v54, %v5155_v38  ;;  %v327_v38 = vand.u32 4294901760, %v326_v36 }
  0x25   :  { %378 = vmatpush.msra.mxu2 %v3199_v59  ;;  %423 = vmatpush.msra.mxu3 %v3183_v50  ;;  %v5223_v36 = vand.u32 4294901760, %v3280_v39  ;;  %v5230_v18 = vand.u32 4294901760, %v3123_v19  ;;  %v5232_v19 = vand.u32 4294901760, %v3126_v20  ;;  %v5234_v20 = vand.u32 4294901760, %v3139_v29 }
  0x26   :  { %229 = vmatpush.msra.mxu0 %v3191_v53  ;;  %298 = vmatpush.msra.mxu1 %v297_v48  ;;  %v315_v48 = vand.u32 4294901760, %v314_v62  ;;  %v73_v62 = vld [vmem:[#allocation6 + $0xb0] sm:$0xff]  ;;  %v5236_v29 = vand.u32 4294901760, %v3164_v40  ;;  %v5238_v40 = vand.u32 4294901760, %v3175_v46  ;;  %v5240_v46 = vand.u32 4294901760, %v3187_v52 }
  0x27   :  { %381 = vmatpush.msra.mxu2 %v3211_v2  ;;  %425 = vmatpush.msra.mxu3 %v3191_v53  ;;  %v601_v42 = vsub.f32 %v3280_v39, %v5223_v36  ;;  %v5225_v36 = vand.u32 4294901760, %v3293_v49 }
  0x28   :  { %231 = vmatpush.msra.mxu0 %v3207_v0  ;;  %304 = vmatpush.msra.mxu1 %v303_v61  ;;  %v589_v61 = vsub.f32 %v3245_v43, %v5154_v7  ;;  %v3317_v7 = vand.u32 4294901760, %v75_v45 }
  0x29   :  { %384 = vmatpush.msra.mxu2 %v3216_v8  ;;  %427 = vmatpush.msra.mxu3 %v3207_v0  ;;  %v607_v21 = vsub.f32 %v3293_v49, %v5225_v36 }
  0x2a   :  { %233 = vmatpush.msra.mxu0 %v3224_v26  ;;  %310 = vmatpush.msra.mxu1 %v309_v37  ;;  %v595_v37 = vsub.f32 %v3262_v57, %v5158_v1  ;;  %v590_v1 = vand.u32 4294901760, %v589_v61  ;;  %v72_v61 = vld [vmem:[#allocation6 + $0xa8] sm:$0xff] }
  0x2b   :  { %387 = vmatpush.msra.mxu2 %v3239_v41  ;;  %429 = vmatpush.msra.mxu3 %v3224_v26  ;;  %v3363_v58 = vand.u32 4294901760, %v72_v61 }
  0x2c   :  { %235 = vmatpush.msra.mxu0 %v3229_v31  ;;  %316 = vmatpush.msra.mxu1 %v315_v48  ;;  %v333_v48 = vand.u32 4294901760, %v332_v47  ;;  %v339_v47 = vand.u32 4294901760, %v338_v60  ;;  %v5227_v60 = vand.u32 4294901760, %v3308_v63 }
  0x2d   :  { %390 = vmatpush.msra.mxu2 %v3252_v54  ;;  %431 = vmatpush.msra.mxu3 %v3229_v31  ;;  %v3351_v31 = vand.u32 4294901760, %v73_v62 }
  0x2e   :  { %442 = vmatpush.msrb.mxu0 %v247_v22  ;;  %322 = vmatpush.msra.mxu1 %v321_v35  ;;  %v596_v22 = vand.u32 4294901760, %v595_v37  ;;  %v3344_v35 = vsub.f32 %v75_v45, %v3317_v7  ;;  %v3356_v45 = vsub.f32 %v74_v6, %v3330_v23  ;;  %v71_v37 = vld [vmem:[#allocation6 + $0xa0] sm:$0xff]  ;;  %v70_v6 = vld [vmem:[#allocation6 + $0x98] sm:$0xff] }
  0x2f   :  { %393 = vmatpush.msra.mxu2 %v3259_v56  ;;  %591 = vmatpush.msrb.mxu3 %v590_v1  ;;  %v3375_v36 = vand.u32 4294901760, %v71_v37  ;;  %v3388_v1 = vand.u32 4294901760, %v70_v6 }
  0x30   :  { %446 = vmatpush.msrb.mxu0 %v5224_v14  ;;  %328 = vmatpush.msra.mxu1 %v327_v38  ;;  %v602_v38 = vand.u32 4294901760, %v601_v42  ;;  %v613_v14 = vsub.f32 %v3308_v63, %v5227_v60  ;;  %v5229_v42 = vand.u32 4294901760, %v3325_v24  ;;  %v3373_v60 = vsub.f32 %v73_v62, %v3351_v31 }
  0x31   :  { %546 = vmatpush.msrb.mxu2 %v3218_v12  ;;  %597 = vmatpush.msrb.mxu3 %v596_v22  ;;  %v3386_v62 = vsub.f32 %v72_v61, %v3363_v58  ;;  %v3399_v61 = vsub.f32 %v71_v37, %v3375_v36 }
  0x32   :  { %450 = vmatpush.msrb.mxu0 %v5226_v15  ;;  %334 = vmatpush.msra.mxu1 %v333_v48  ;;  %v608_v48 = vand.u32 4294901760, %v607_v21  ;;  %v619_v15 = vsub.f32 %v3325_v24, %v5229_v42  ;;  %v614_v21 = vand.u32 4294901760, %v613_v14 }
  0x33   :  { %548 = vmatpush.msrb.mxu2 %v3231_v32  ;;  %603 = vmatpush.msrb.mxu3 %v602_v38  ;;  %v69_v38 = vld [vmem:[#allocation6 + $0x90] sm:$0xff] }
  0x34   :  { %454 = vmatpush.msrb.mxu0 %v5228_v16  ;;  %340 = vmatpush.msra.mxu1 %v339_v47  ;;  %v188_v47 = vld.sshfl [vmem:[#allocation1] sm:$0xff pattern:$0x73625140]  ;;  %v5231_v16 = vand.u32 4294901760, %v3338_v27  ;;  %v620_v14 = vand.u32 4294901760, %v619_v15  ;;  %v3411_v37 = vand.u32 4294901760, %v69_v38 }
  0x35   :  { %550 = vmatpush.msrb.mxu2 %v3254_v55  ;;  %609 = vmatpush.msrb.mxu3 %v608_v48  ;;  %v3401_v22 = vand.u32 4294901760, %v188_v47 }
  0x36   :  { %458 = vmatpush.msrb.mxu0 %v5230_v18  ;;  %509 = vmatpush.msrb.mxu1 %v3094_v3  ;;  %v625_v42 = vsub.f32 %v3338_v27, %v5231_v16  ;;  %v5233_v3 = vand.u32 4294901760, %v3344_v35  ;;  %v3414_v16 = vsub.f32 %v70_v6, %v3388_v1 }
  0x37   :  { %552 = vmatpush.msrb.mxu2 %v3269_v13  ;;  %615 = vmatpush.msrb.mxu3 %v614_v21  ;;  %v5237_v21 = vand.u32 4294901760, %v3373_v60  ;;  %v3425_v15 = vsub.f32 %v188_v47, %v3401_v22  ;;  %v3438_v47 = vsub.f32 %v69_v38, %v3411_v37 }
  0x38   :  { %462 = vmatpush.msrb.mxu0 %v5232_v19  ;;  %511 = vmatpush.msrb.mxu1 %v3096_v4  ;;  %v631_v18 = vsub.f32 %v3344_v35, %v5233_v3  ;;  %v5235_v4 = vand.u32 4294901760, %v3356_v45  ;;  %v68_v3 = vld [vmem:[#allocation6 + $0x88] sm:$0xff]  ;;  %v626_v48 = vand.u32 4294901760, %v625_v42 }
  0x39   :  { %554 = vmatpush.msrb.mxu2 %v3282_v30  ;;  %621 = vmatpush.msrb.mxu3 %v620_v14  ;;  %v643_v42 = vsub.f32 %v3373_v60, %v5237_v21  ;;  %v3427_v6 = vand.u32 4294901760, %v68_v3 }
  0x3a   :  { %466 = vmatpush.msrb.mxu0 %v5234_v20  ;;  %513 = vmatpush.msrb.mxu1 %v3098_v5  ;;  %v637_v19 = vsub.f32 %v3356_v45, %v5235_v4  ;;  %v632_v5 = vand.u32 4294901760, %v631_v18  ;;  %v67_v20 = vld [vmem:[#allocation6 + $0x80] sm:$0xff]  ;;  %v654_v4 = vand.u32 4294901760, %v3399_v61  ;;  %v5239_v18 = vand.u32 4294901760, %v3386_v62 }
  0x3b   :  { %556 = vmatpush.msrb.mxu2 %v3295_v51  ;;  %627 = vmatpush.msrb.mxu3 %v626_v48  ;;  %v3440_v21 = vand.u32 4294901760, %v67_v20  ;;  %v238_v48 = vand.u32 4294901760, %v3425_v15  ;;  %v3451_v38 = vsub.f32 %v68_v3, %v3427_v6  ;;  %v5242_v3 = vand.u32 4294901760, %v3211_v2 }
  0x3c   :  { %470 = vmatpush.msrb.mxu0 %v5236_v29  ;;  %515 = vmatpush.msrb.mxu1 %v3100_v9  ;;  %v638_v9 = vand.u32 4294901760, %v637_v19  ;;  %v649_v14 = vsub.f32 %v3386_v62, %v5239_v18  ;;  %v660_v29 = vand.u32 4294901760, %v3414_v16  ;;  %v655_v19 = vsub.f32 %v3399_v61, %v654_v4 }
  0x3d   :  { %558 = vmatpush.msrb.mxu2 %v3310_v28  ;;  %633 = vmatpush.msrb.mxu3 %v632_v5  ;;  %v666_v5 = vand.u32 4294901760, %v3438_v47  ;;  %v672_v18 = vand.u32 4294901760, %v3451_v38 }
  0x3e   :  { %474 = vmatpush.msrb.mxu0 %v5238_v40  ;;  %517 = vmatpush.msrb.mxu1 %v3102_v10  ;;  %v644_v10 = vand.u32 4294901760, %v643_v42  ;;  %v5241_v40 = vand.u32 4294901760, %v3199_v59  ;;  %v661_v52 = vsub.f32 %v3414_v16, %v660_v29  ;;  %v3462_v42 = vsub.f32 %v67_v20, %v3440_v21  ;;  %v189_v59 = vld.sshfl [vmem:[#allocation1 + $0x8] sm:$0xff pattern:$0x73625140] }
  0x3f   :  { %560 = vmatpush.msrb.mxu2 %v3317_v7  ;;  %639 = vmatpush.msrb.mxu3 %v638_v9  ;;  %v239_v9 = vsub.f32 %v3425_v15, %v238_v48 }
  0x40   :  { %478 = vmatpush.msrb.mxu0 %v5240_v46  ;;  %519 = vmatpush.msrb.mxu1 %v3104_v11  ;;  %v650_v11 = vand.u32 4294901760, %v649_v14  ;;  %v5243_v14 = vand.u32 4294901760, %v3216_v8  ;;  %v662_v2 = vand.u32 4294901760, %v661_v52  ;;  %v678_v20 = vand.u32 4294901760, %v3462_v42 }
  0x41   :  { %562 = vmatpush.msrb.mxu2 %v3330_v23  ;;  %645 = vmatpush.msrb.mxu3 %v644_v10  ;;  %v3478_v46 = vand.u32 4294901760, %v189_v59  ;;  %v5244_v10 = vand.u32 4294901760, %v3239_v41  ;;  %v673_v8 = vsub.f32 %v3451_v38, %v672_v18 }
  0x42   :  { %482 = vmatpush.msrb.mxu0 %v5241_v40  ;;  %521 = vmatpush.msrb.mxu1 %v3117_v17  ;;  %v656_v17 = vand.u32 4294901760, %v655_v19  ;;  %v5245_v19 = vand.u32 4294901760, %v3252_v54 }
  0x43   :  { %564 = vmatpush.msrb.mxu2 %v3351_v31  ;;  %651 = vmatpush.msrb.mxu3 %v650_v11  ;;  %v3495_v40 = vsub.f32 %v189_v59, %v3478_v46  ;;  %v5246_v11 = vand.u32 4294901760, %v3259_v56  ;;  %v5249_v56 = vld [vmem:[#allocation12_spill] sm:$0xff] }
  0x44   :  { %486 = vmatpush.msrb.mxu0 %v5242_v3  ;;  %523 = vmatpush.msrb.mxu1 %v3133_v25  ;;  %v667_v25 = vsub.f32 %v3438_v47, %v666_v5 }
  0x45   :  { %566 = vmatpush.msrb.mxu2 %v3363_v58  ;;  %657 = vmatpush.msrb.mxu3 %v656_v17  ;;  %v579_v52 = vand.u32 4294901760, %v3495_v40 }
  0x46   :  { %490 = vmatpush.msrb.mxu0 %v5243_v14  ;;  %525 = vmatpush.msrb.mxu1 %v3152_v33  ;;  %v240_v33 = vand.u32 4294901760, %v239_v9  ;;  %v668_v41 = vand.u32 4294901760, %v667_v25  ;;  %v89_v9 = vld [vmem:[#allocation6 + $0x130] sm:$0xff] }
  0x47   :  { %568 = vmatpush.msrb.mxu2 %v3375_v36  ;;  %663 = vmatpush.msrb.mxu3 %v662_v2 }
  0x48   :  { %494 = vmatpush.msrb.mxu0 %v5244_v10  ;;  %527 = vmatpush.msrb.mxu1 %v3155_v34  ;;  %v679_v34 = vsub.f32 %v3462_v42, %v678_v20 }
  0x49   :  { %570 = vmatpush.msrb.mxu2 %v3388_v1  ;;  %241 = vmatmul.f32.vlgmr.msra.gmra.mxu0 %v240_v33  ;;  %v3663_v33 = vand.u32 4294901760, %v89_v9 }
  0x4a   :  { %498 = vmatpush.msrb.mxu0 %v5245_v19  ;;  %529 = vmatpush.msrb.mxu1 %v3171_v44  ;;  %v674_v44 = vand.u32 4294901760, %v673_v8  ;;  %v680_v54 = vand.u32 4294901760, %v679_v34  ;;  %v87_v19 = vld [vmem:[#allocation6 + $0x120] sm:$0xff] }
  0x4b   :  { %572 = vmatpush.msrb.mxu2 %v3411_v37  ;;  %669 = vmatpush.msrb.mxu3 %v668_v41 }
  0x4c   :  { %502 = vmatpush.msrb.mxu0 %v5246_v11  ;;  %531 = vmatpush.msrb.mxu1 %v3183_v50  ;;  %v5247_v50 = vand.u32 4294901760, %v3245_v43 }
  0x4d   :  { %574 = vmatpush.msrb.mxu2 %v3427_v6  ;;  %675 = vmatpush.msrb.mxu3 %v674_v44 }
  0x4e   :  { %689 = vmatpush.msra.mxu0 %v3245_v43  ;;  %533 = vmatpush.msrb.mxu1 %v3191_v53  ;;  %v580_v53 = vsub.f32 %v3495_v40, %v579_v52 }
  0x4f   :  { %576 = vmatpush.msrb.mxu2 %v3440_v21  ;;  %681 = vmatpush.msrb.mxu3 %v680_v54 }
  0x50   :  { %692 = vmatpush.msra.mxu0 %v3262_v57  ;;  %535 = vmatpush.msrb.mxu1 %v3207_v0  ;;  %v5248_v0 = vand.u32 4294901760, %v3262_v57  ;;  %v581_v43 = vand.u32 4294901760, %v580_v53  ;;  %v5251_v57 = vand.u32 4294901760, %v3293_v49  ;;  %v3687_v53 = vand.u32 4294901760, %v87_v19 }
  0x51   :  { %396 = vmatmul.f32.vlgmr.msra.gmra.mxu2 %v3425_v15  ;;  %435 = vmatmul.f32.vlgmr.msra.gmra.mxu3 %v238_v48  ;;  %v92_v15 = vld [vmem:[#allocation6 + $0x148] sm:$0xff] }
  0x52   :  { %695 = vmatpush.msra.mxu0 %v3280_v39  ;;  %783 = vmatpush.msra.mxu2 %v5247_v50  ;;  %v3626_v48 = vand.u32 4294901760, %v92_v15 }
  0x53   :  { %537 = vmatpush.msrb.mxu1 %v3224_v26  ;;  %850 = vmatpush.msra.mxu3 %v3218_v12  ;;  %v5250_v26 = vand.u32 4294901760, %v3280_v39  ;;  %v5252_v39 = vand.u32 4294901760, %v3308_v63 }
  0x54   :  { %698 = vmatpush.msra.mxu0 %v3293_v49  ;;  %787 = vmatpush.msra.mxu2 %v5248_v0  ;;  %v3653_v25 = vsub.f32 %v92_v15, %v3626_v48 }
  0x55   :  { %539 = vmatpush.msrb.mxu1 %v5249_v56  ;;  %852 = vmatpush.msra.mxu3 %v3231_v32  ;;  %v3691_v56 = vsub.f32 %v89_v9, %v3663_v33 }
  0x56   :  { %701 = vmatpush.msra.mxu0 %v3308_v63  ;;  %342 = vmatmul.f32.vlgmr.msra.gmra.mxu1 %v3401_v22  ;;  %v5168_v11 = vand.u32 4294901760, %v3653_v25 }
  0x57   :  { %791 = vmatpush.msra.mxu2 %v5250_v26  ;;  %742 = vmatpush.msra.mxu1 %v3218_v12  ;;  %v5253_v12 = vand.u32 4294901760, %v3325_v24 }
  0x58   :  { %704 = vmatpush.msra.mxu0 %v3325_v24  ;;  %854 = vmatpush.msra.mxu3 %v3254_v55  ;;  %v5255_v24 = vand.u32 4294901760, %v3344_v35 }
  0x59   :  { %795 = vmatpush.msra.mxu2 %v5251_v57  ;;  %744 = vmatpush.msra.mxu1 %v3231_v32  ;;  %v5254_v32 = vand.u32 4294901760, %v3338_v27 }
  0x5a   :  { %582 = vmatmul.f32.vlgmr.msrb.gmra.mxu2 %v581_v43  ;;  %707 = vmatpush.msra.mxu0 %v3338_v27  ;;  %v97_v27 = vld [vmem:[#allocation6 + $0x170] sm:$0xff] }
  0x5b   :  { %746 = vmatpush.msra.mxu1 %v3254_v55  ;;  %799 = vmatpush.msra.mxu2 %v5252_v39  ;;  %v98_v55 = vld [vmem:[#allocation6 + $0x178] sm:$0xff]  ;;  %v3571_v49 = vand.u32 4294901760, %v97_v27  ;;  %v85_v43 = vld [vmem:[#allocation6 + $0x110] sm:$0xff]  ;;  %v966_v39 = vsub.f32 %v3653_v25, %v5168_v11 }
  0x5c   :  { %856 = vmatpush.msra.mxu3 %v3269_v13  ;;  %504 = vmatmul.f32.vlgmr.msrb.gmra.mxu0 %v3401_v22  ;;  %v3564_v63 = vand.u32 4294901760, %v98_v55 }
  0x5d   :  { %683 = vmatmul.f32.vlgmr.msrb.gmra.mxu3 %v3478_v46  ;;  %710 = vmatpush.msra.mxu0 %v3344_v35 }
  0x5e   :  { %748 = vmatpush.msra.mxu1 %v3269_v13  ;;  %803 = vmatpush.msra.mxu2 %v5253_v12  ;;  %v5258_v13 = vand.u32 4294901760, %v3386_v62 }
  0x5f   :  { %858 = vmatpush.msra.mxu3 %v3282_v30  ;;  %541 = vmatmul.f32.vlgmr.msrb.gmra.mxu1 %v3401_v22  ;;  %v93_v22 = vld [vmem:[#allocation6 + $0x150] sm:$0xff] }
  0x60   :  { %713 = vmatpush.msra.mxu0 %v3356_v45  ;;  %750 = vmatpush.msra.mxu1 %v3282_v30  ;;  %v5256_v30 = vand.u32 4294901760, %v3356_v45  ;;  %v94_v45 = vld [vmem:[#allocation6 + $0x158] sm:$0xff] }
  0x61   :  { %807 = vmatpush.msra.mxu2 %v5254_v32  ;;  %860 = vmatpush.msra.mxu3 %v3295_v51 }
  0x62   :  { %716 = vmatpush.msra.mxu0 %v3373_v60  ;;  %752 = vmatpush.msra.mxu1 %v3295_v51  ;;  %v5257_v51 = vand.u32 4294901760, %v3373_v60  ;;  %v3591_v60 = vsub.f32 %v97_v27, %v3571_v49  ;;  %v3713_v27 = vand.u32 4294901760, %v85_v43 }
  0x63   :  { %811 = vmatpush.msra.mxu2 %v5255_v24  ;;  %862 = vmatpush.msra.mxu3 %v3310_v28 }
  0x64   :  { %719 = vmatpush.msra.mxu0 %v3386_v62  ;;  %754 = vmatpush.msra.mxu1 %v3310_v28  ;;  %v96_v28 = vld [vmem:[#allocation6 + $0x168] sm:$0xff]  ;;  %v3595_v62 = vand.u32 4294901760, %v94_v45 }
  0x65   :  { %815 = vmatpush.msra.mxu2 %v5256_v30  ;;  %864 = vmatpush.msra.mxu3 %v3317_v7  ;;  %v3578_v35 = vand.u32 4294901760, %v96_v28 }
  0x66   :  { %722 = vmatpush.msra.mxu0 %v3399_v61  ;;  %756 = vmatpush.msra.mxu1 %v3317_v7  ;;  %v95_v7 = vld [vmem:[#allocation6 + $0x160] sm:$0xff]  ;;  %v3606_v61 = vand.u32 4294901760, %v93_v22 }
  0x67   :  { %819 = vmatpush.msra.mxu2 %v5257_v51  ;;  %866 = vmatpush.msra.mxu3 %v3330_v23  ;;  %v5165_v51 = vand.u32 4294901760, %v3691_v56 }
  0x68   :  { %725 = vmatpush.msra.mxu0 %v3414_v16  ;;  %758 = vmatpush.msra.mxu1 %v3330_v23  ;;  %v3581_v23 = vsub.f32 %v98_v55, %v3564_v63  ;;  %v3602_v16 = vsub.f32 %v96_v28, %v3578_v35  ;;  %v3717_v28 = vsub.f32 %v87_v19, %v3687_v53 }
  0x69   :  { %823 = vmatpush.msra.mxu2 %v5258_v13  ;;  %868 = vmatpush.msra.mxu3 %v3351_v31  ;;  %v84_v13 = vld [vmem:[#allocation6 + $0x108] sm:$0xff] }
  0x6a   :  { %728 = vmatpush.msra.mxu0 %v3438_v47  ;;  %760 = vmatpush.msra.mxu1 %v3351_v31  ;;  %v3588_v31 = vand.u32 4294901760, %v95_v7 }
  0x6b   :  { %827 = vmatpush.msra.mxu2 %v654_v4  ;;  %870 = vmatpush.msra.mxu3 %v3363_v58 }
  0x6c   :  { %731 = vmatpush.msra.mxu0 %v3451_v38  ;;  %762 = vmatpush.msra.mxu1 %v3363_v58  ;;  %v929_v58 = vand.u32 4294901760, %v3581_v23  ;;  %v3613_v4 = vsub.f32 %v95_v7, %v3588_v31  ;;  %v941_v38 = vand.u32 4294901760, %v3602_v16 }
  0x6d   :  { %831 = vmatpush.msra.mxu2 %v660_v29  ;;  %872 = vmatpush.msra.mxu3 %v3375_v36  ;;  %v3618_v29 = vsub.f32 %v94_v45, %v3595_v62  ;;  %v967_v45 = vand.u32 4294901760, %v966_v39 }
  0x6e   :  { %734 = vmatpush.msra.mxu0 %v3462_v42  ;;  %764 = vmatpush.msra.mxu1 %v3375_v36  ;;  %v935_v36 = vand.u32 4294901760, %v3591_v60  ;;  %v930_v47 = vsub.f32 %v3581_v23, %v929_v58  ;;  %v5174_v59 = vand.u32 4294901760, %v3613_v4  ;;  %v942_v14 = vsub.f32 %v3602_v16, %v941_v38 }
  0x6f   :  { %835 = vmatpush.msra.mxu2 %v666_v5  ;;  %874 = vmatpush.msra.mxu3 %v3388_v1  ;;  %v90_v5 = vld [vmem:[#allocation6 + $0x138] sm:$0xff]  ;;  %v5171_v17 = vand.u32 4294901760, %v3618_v29 }
  0x70   :  { %737 = vmatmul.f32.vlgmr.msra.gmra.mxu0 %v3495_v40  ;;  %766 = vmatpush.msra.mxu1 %v3388_v1  ;;  %v91_v1 = vld [vmem:[#allocation6 + $0x140] sm:$0xff]  ;;  %v936_v42 = vsub.f32 %v3591_v60, %v935_v36  ;;  %v3650_v2 = vand.u32 4294901760, %v90_v5  ;;  %v948_v10 = vsub.f32 %v3613_v4, %v5174_v59  ;;  %v943_v41 = vand.u32 4294901760, %v942_v14  ;;  %v190_v40 = vld.sshfl [vmem:[#allocation1 + $0x10] sm:$0xff pattern:$0x73625140] }
  0x71   :  { %887 = vmatpush.msrb.mxu0 %v3564_v63  ;;  %839 = vmatpush.msra.mxu2 %v672_v18  ;;  %v3639_v3 = vand.u32 4294901760, %v91_v1  ;;  %v931_v18 = vand.u32 4294901760, %v930_v47  ;;  %v3695_v57 = vand.u32 4294901760, %v190_v40  ;;  %v114_v47 = vld [vmem:[#allocation6 + $0x1f8] sm:$0xff]  ;;  %v5162_v14 = vand.u32 4294901760, %v3717_v28 }
  0x72   :  { %876 = vmatpush.msra.mxu3 %v3411_v37  ;;  %768 = vmatpush.msra.mxu1 %v3411_v37  ;;  %v3632_v37 = vsub.f32 %v93_v22, %v3606_v61  ;;  %v3679_v44 = vsub.f32 %v90_v5, %v3650_v2  ;;  %v949_v50 = vand.u32 4294901760, %v948_v10  ;;  %v3734_v5 = vand.u32 4294901760, %v84_v13  ;;  %v106_v59 = vld [vmem:[#allocation6 + $0x1b8] sm:$0xff] }
  0x73   :  { %889 = vmatpush.msrb.mxu0 %v3571_v49  ;;  %843 = vmatpush.msra.mxu2 %v678_v20  ;;  %v88_v20 = vld [vmem:[#allocation6 + $0x128] sm:$0xff]  ;;  %v3666_v8 = vsub.f32 %v91_v1, %v3639_v3  ;;  %v3722_v7 = vsub.f32 %v190_v40, %v3695_v57  ;;  %v3747_v10 = vand.u32 4294901760, %v114_v47 }
  0x74   :  { %878 = vmatpush.msra.mxu3 %v3427_v6  ;;  %845 = vmatmul.f32.vlgmr.msra.gmra.mxu2 %v3478_v46  ;;  %v3675_v34 = vand.u32 4294901760, %v88_v20  ;;  %v5166_v32 = vand.u32 4294901760, %v3679_v44 }
  0x75   :  { %891 = vmatpush.msrb.mxu0 %v3578_v35  ;;  %1030 = vmatpush.msrb.mxu2 %v3581_v23  ;;  %v5167_v0 = vand.u32 4294901760, %v3666_v8 }
  0x76   :  { %770 = vmatpush.msra.mxu1 %v3427_v6  ;;  %880 = vmatpush.msra.mxu3 %v3440_v21  ;;  %v5170_v6 = vand.u32 4294901760, %v3632_v37  ;;  %v3705_v24 = vsub.f32 %v88_v20, %v3675_v34  ;;  %v978_v22 = vsub.f32 %v3679_v44, %v5166_v32  ;;  %v3742_v20 = vsub.f32 %v85_v43, %v3713_v27 }
  0x77   :  { %882 = vmatmul.f32.vlgmr.msra.gmra.mxu3 %v3478_v46  ;;  %893 = vmatpush.msrb.mxu0 %v3588_v31  ;;  %v937_v46 = vand.u32 4294901760, %v936_v42  ;;  %v972_v30 = vsub.f32 %v3666_v8, %v5167_v0  ;;  %v83_v42 = vld [vmem:[#allocation6 + $0x100] sm:$0xff]  ;;  %v996_v43 = vsub.f32 %v3717_v28, %v5162_v14 }
  0x78   :  { %1033 = vmatpush.msrb.mxu2 %v3591_v60  ;;  %1083 = vmatpush.msrb.mxu3 %v3564_v63  ;;  %v960_v54 = vsub.f32 %v3632_v37, %v5170_v6  ;;  %v5163_v15 = vand.u32 4294901760, %v3705_v24  ;;  %v979_v19 = vand.u32 4294901760, %v978_v22  ;;  %v3753_v40 = vand.u32 4294901760, %v83_v42 }
  0x79   :  { %772 = vmatpush.msra.mxu1 %v3440_v21  ;;  %895 = vmatpush.msrb.mxu0 %v3595_v62  ;;  %v954_v21 = vsub.f32 %v3618_v29, %v5171_v17  ;;  %v973_v9 = vand.u32 4294901760, %v972_v30  ;;  %v5169_v39 = vand.u32 4294901760, %v3742_v20  ;;  %v111_v30 = vld [vmem:[#allocation6 + $0x1e0] sm:$0xff] }
  0x7a   :  { %776 = vmatmul.f32.vlgmr.msra.gmra.mxu1 %v579_v52  ;;  %1036 = vmatpush.msrb.mxu2 %v3602_v16  ;;  %v86_v52 = vld [vmem:[#allocation6 + $0x118] sm:$0xff]  ;;  %v961_v55 = vand.u32 4294901760, %v960_v54 }
  0x7b   :  { %932 = vmatpush.msrb.mxu1 %v931_v18  ;;  %1085 = vmatpush.msrb.mxu3 %v3571_v49  ;;  %v955_v26 = vand.u32 4294901760, %v954_v21  ;;  %v3701_v12 = vand.u32 4294901760, %v86_v52  ;;  %v984_v18 = vsub.f32 %v3691_v56, %v5165_v51  ;;  %v113_v21 = vld [vmem:[#allocation6 + $0x1f0] sm:$0xff] }
  0x7c   :  { %897 = vmatpush.msrb.mxu0 %v3606_v61  ;;  %1039 = vmatpush.msrb.mxu2 %v3613_v4 }
  0x7d   :  { %938 = vmatpush.msrb.mxu1 %v937_v46  ;;  %1087 = vmatpush.msrb.mxu3 %v3578_v35  ;;  %v3730_v1 = vsub.f32 %v86_v52, %v3701_v12  ;;  %v5176_v46 = vand.u32 4294901760, %v3722_v7  ;;  %v3759_v52 = vsub.f32 %v84_v13, %v3734_v5 }
  0x7e   :  { %899 = vmatpush.msrb.mxu0 %v3626_v48  ;;  %1042 = vmatpush.msrb.mxu2 %v3618_v29 }
  0x7f   :  { %944 = vmatpush.msrb.mxu1 %v943_v41  ;;  %1089 = vmatpush.msrb.mxu3 %v3588_v31  ;;  %v990_v41 = vsub.f32 %v3705_v24, %v5163_v15  ;;  %v5164_v54 = vand.u32 4294901760, %v3730_v1  ;;  %v921_v13 = vsub.f32 %v3722_v7, %v5176_v46  ;;  %v110_v15 = vld [vmem:[#allocation6 + $0x1d8] sm:$0xff]  ;;  %v105_v46 = vld [vmem:[#allocation6 + $0x1b0] sm:$0xff] }
  0x80   :  { %901 = vmatpush.msrb.mxu0 %v3639_v3  ;;  %1045 = vmatpush.msrb.mxu2 %v3632_v37  ;;  %v3800_v0 = vand.u32 4294901760, %v110_v15 }
  0x81   :  { %950 = vmatpush.msrb.mxu1 %v949_v50  ;;  %1091 = vmatpush.msrb.mxu3 %v3595_v62  ;;  %v112_v50 = vld [vmem:[#allocation6 + $0x1e8] sm:$0xff]  ;;  %v991_v22 = vand.u32 4294901760, %v990_v41  ;;  %v997_v41 = vand.u32 4294901760, %v996_v43  ;;  %v922_v51 = vand.u32 4294901760, %v921_v13 }
  0x82   :  { %903 = vmatpush.msrb.mxu0 %v3650_v2  ;;  %1048 = vmatpush.msrb.mxu2 %v3653_v25  ;;  %v3783_v14 = vand.u32 4294901760, %v112_v50 }
  0x83   :  { %956 = vmatpush.msrb.mxu1 %v955_v26  ;;  %1093 = vmatpush.msrb.mxu3 %v3606_v61  ;;  %v985_v26 = vand.u32 4294901760, %v984_v18  ;;  %v3781_v18 = vsub.f32 %v83_v42, %v3753_v40  ;;  %v1008_v42 = vsub.f32 %v3742_v20, %v5169_v39 }
  0x84   :  { %905 = vmatpush.msrb.mxu0 %v3663_v33  ;;  %1051 = vmatpush.msrb.mxu2 %v3666_v8  ;;  %v3805_v39 = vsub.f32 %v112_v50, %v3783_v14 }
  0x85   :  { %962 = vmatpush.msrb.mxu1 %v961_v55  ;;  %1095 = vmatpush.msrb.mxu3 %v3626_v48  ;;  %v3766_v55 = vand.u32 4294901760, %v113_v21  ;;  %v5175_v11 = vand.u32 4294901760, %v3781_v18 }
  0x86   :  { %907 = vmatpush.msrb.mxu0 %v3675_v34  ;;  %1054 = vmatpush.msrb.mxu2 %v3679_v44 }
  0x87   :  { %968 = vmatpush.msrb.mxu1 %v967_v45  ;;  %1097 = vmatpush.msrb.mxu3 %v3639_v3  ;;  %v3774_v45 = vsub.f32 %v114_v47, %v3747_v10  ;;  %v5172_v47 = vand.u32 4294901760, %v3759_v52 }
  0x88   :  { %909 = vmatpush.msrb.mxu0 %v3687_v53  ;;  %1057 = vmatpush.msrb.mxu2 %v3691_v56 }
  0x89   :  { %974 = vmatpush.msrb.mxu1 %v973_v9  ;;  %1099 = vmatpush.msrb.mxu3 %v3650_v2  ;;  %v1002_v9 = vsub.f32 %v3730_v1, %v5164_v54  ;;  %v3795_v54 = vsub.f32 %v113_v21, %v3766_v55  ;;  %v5173_v32 = vand.u32 4294901760, %v3774_v45  ;;  %v1014_v21 = vsub.f32 %v3759_v52, %v5172_v47 }
  0x8a   :  { %911 = vmatpush.msrb.mxu0 %v3701_v12  ;;  %1060 = vmatpush.msrb.mxu2 %v3705_v24  ;;  %v3824_v47 = vsub.f32 %v110_v15, %v3800_v0 }
  0x8b   :  { %980 = vmatpush.msrb.mxu1 %v979_v19  ;;  %1101 = vmatpush.msrb.mxu3 %v3663_v33  ;;  %v3788_v19 = vand.u32 4294901760, %v111_v30  ;;  %v1003_v43 = vand.u32 4294901760, %v1002_v9  ;;  %v1009_v9 = vand.u32 4294901760, %v1008_v42  ;;  %v5178_v6 = vand.u32 4294901760, %v3795_v54 }
  0x8c   :  { %913 = vmatpush.msrb.mxu0 %v3713_v27  ;;  %1063 = vmatpush.msrb.mxu2 %v3717_v28  ;;  %v1271_v17 = vsub.f32 %v3774_v45, %v5173_v32  ;;  %v1015_v32 = vand.u32 4294901760, %v1014_v21 }
  0x8d   :  { %986 = vmatpush.msrb.mxu1 %v985_v26  ;;  %1103 = vmatpush.msrb.mxu3 %v3675_v34  ;;  %v109_v26 = vld [vmem:[#allocation6 + $0x1d0] sm:$0xff]  ;;  %v3813_v13 = vsub.f32 %v111_v30, %v3788_v19  ;;  %v107_v30 = vld [vmem:[#allocation6 + $0x1c0] sm:$0xff]  ;;  %v1277_v23 = vsub.f32 %v3795_v54, %v5178_v6 }
  0x8e   :  { %915 = vmatpush.msrb.mxu0 %v3734_v5  ;;  %1066 = vmatpush.msrb.mxu2 %v3730_v1  ;;  %v3817_v50 = vand.u32 4294901760, %v109_v26  ;;  %v1272_v21 = vand.u32 4294901760, %v1271_v17  ;;  %v5259_v17 = vand.u32 4294901760, %v3722_v7 }
  0x8f   :  { %992 = vmatpush.msrb.mxu1 %v991_v22  ;;  %1105 = vmatpush.msrb.mxu3 %v3687_v53  ;;  %v108_v22 = vld [vmem:[#allocation6 + $0x1c8] sm:$0xff]  ;;  %v5179_v15 = vand.u32 4294901760, %v3813_v13 }
  0x90   :  { %917 = vmatpush.msrb.mxu0 %v3753_v40  ;;  %1069 = vmatpush.msrb.mxu2 %v3742_v20  ;;  %v3832_v42 = vand.u32 4294901760, %v108_v22 }
  0x91   :  { %998 = vmatpush.msrb.mxu1 %v997_v41  ;;  %1107 = vmatpush.msrb.mxu3 %v3701_v12  ;;  %v1020_v41 = vsub.f32 %v3781_v18, %v5175_v11  ;;  %v5180_v11 = vand.u32 4294901760, %v3824_v47  ;;  %v1289_v16 = vsub.f32 %v3813_v13, %v5179_v15 }
  0x92   :  { %923 = vmatmul.f32.vlgmr.msrb.gmra.mxu0 %v922_v51  ;;  %1072 = vmatpush.msrb.mxu2 %v3759_v52  ;;  %v5177_v51 = vand.u32 4294901760, %v3805_v39 }
  0x93   :  { %1124 = vmatpush.msra.mxu0 %v929_v58  ;;  %1004 = vmatpush.msrb.mxu1 %v1003_v43  ;;  %v3843_v58 = vsub.f32 %v109_v26, %v3817_v50  ;;  %v3845_v43 = vand.u32 4294901760, %v107_v30  ;;  %v1021_v60 = vand.u32 4294901760, %v1020_v41  ;;  %v3857_v26 = vsub.f32 %v108_v22, %v3832_v42  ;;  %v102_v22 = vld [vmem:[#allocation6 + $0x198] sm:$0xff] }
  0x94   :  { %1109 = vmatpush.msrb.mxu3 %v3713_v27  ;;  %1075 = vmatpush.msrb.mxu2 %v3781_v18  ;;  %v5260_v41 = vand.u32 4294901760, %v3613_v4  ;;  %v1295_v15 = vsub.f32 %v3824_v47, %v5180_v11  ;;  %v5261_v4 = vand.u32 4294901760, %v3618_v29  ;;  %v5263_v11 = vand.u32 4294901760, %v3632_v37 }
  0x95   :  { %1128 = vmatpush.msra.mxu0 %v935_v36  ;;  %1010 = vmatpush.msrb.mxu1 %v1009_v9  ;;  %v1283_v36 = vsub.f32 %v3805_v39, %v5177_v51  ;;  %v3859_v9 = vand.u32 4294901760, %v106_v59  ;;  %v1278_v51 = vand.u32 4294901760, %v1277_v23  ;;  %v3871_v6 = vsub.f32 %v107_v30, %v3845_v43 }
  0x96   :  { %1111 = vmatpush.msrb.mxu3 %v3734_v5  ;;  %1078 = vmatmul.f32.vlgmr.msrb.gmra.mxu2 %v3722_v7  ;;  %v103_v7 = vld [vmem:[#allocation6 + $0x1a0] sm:$0xff]  ;;  %v5262_v29 = vand.u32 4294901760, %v3843_v58  ;;  %v5264_v37 = vand.u32 4294901760, %v3653_v25  ;;  %v5266_v25 = vand.u32 4294901760, %v3666_v8  ;;  %v5268_v8 = vand.u32 4294901760, %v3679_v44 }
  0x97   :  { %1132 = vmatpush.msra.mxu0 %v941_v38  ;;  %1228 = vmatpush.msra.mxu2 %v3747_v10  ;;  %v104_v38 = vld [vmem:[#allocation6 + $0x1a8] sm:$0xff]  ;;  %v1284_v23 = vand.u32 4294901760, %v1283_v36  ;;  %v3883_v30 = vsub.f32 %v106_v59, %v3859_v9  ;;  %v101_v36 = vld [vmem:[#allocation6 + $0x190] sm:$0xff] }
  0x98   :  { %1016 = vmatpush.msrb.mxu1 %v1015_v32  ;;  %1113 = vmatpush.msrb.mxu3 %v3753_v40  ;;  %v3873_v32 = vand.u32 4294901760, %v105_v46 }
  0x99   :  { %1117 = vmatmul.f32.vlgmr.msrb.gmra.mxu3 %v5259_v17  ;;  %1136 = vmatpush.msra.mxu0 %v5260_v41  ;;  %v5181_v17 = vand.u32 4294901760, %v3857_v26  ;;  %v3885_v41 = vand.u32 4294901760, %v104_v38 }
  0x9a   :  { %1230 = vmatpush.msra.mxu2 %v3766_v55  ;;  %1273 = vmatpush.msra.mxu3 %v1272_v21  ;;  %v1290_v21 = vand.u32 4294901760, %v1289_v16  ;;  %v3895_v59 = vsub.f32 %v105_v46, %v3873_v32  ;;  %v1296_v16 = vand.u32 4294901760, %v1295_v15 }
  0x9b   :  { %1022 = vmatpush.msrb.mxu1 %v1021_v60  ;;  %1140 = vmatpush.msra.mxu0 %v5261_v4  ;;  %v1301_v60 = vsub.f32 %v3843_v58, %v5262_v29  ;;  %v3897_v4 = vand.u32 4294901760, %v103_v7  ;;  %v3908_v46 = vsub.f32 %v104_v38, %v3885_v41  ;;  %v3910_v29 = vand.u32 4294901760, %v102_v22 }
  0x9c   :  { %1024 = vmatmul.f32.vlgmr.msrb.gmra.mxu1 %v3695_v57  ;;  %1232 = vmatpush.msra.mxu2 %v3783_v14 }
  0x9d   :  { %1191 = vmatpush.msra.mxu1 %v3564_v63  ;;  %1279 = vmatpush.msra.mxu3 %v1278_v51  ;;  %v1307_v63 = vsub.f32 %v3857_v26, %v5181_v17  ;;  %v3921_v38 = vsub.f32 %v103_v7, %v3897_v4  ;;  %v100_v17 = vld [vmem:[#allocation6 + $0x188] sm:$0xff]  ;;  %v191_v51 = vld.sshfl [vmem:[#allocation1 + $0x18] sm:$0xff pattern:$0x73625140]  ;;  %v5270_v7 = vand.u32 4294901760, %v3691_v56  ;;  %v5272_v56 = vand.u32 4294901760, %v3705_v24 }
  0x9e   :  { %1144 = vmatpush.msra.mxu0 %v5263_v11  ;;  %1234 = vmatpush.msra.mxu2 %v3788_v19  ;;  %v5265_v11 = vand.u32 4294901760, %v3871_v6 }
  0x9f   :  { %1193 = vmatpush.msra.mxu1 %v3571_v49  ;;  %1285 = vmatpush.msra.mxu3 %v1284_v23  ;;  %v1302_v49 = vand.u32 4294901760, %v1301_v60  ;;  %v99_v23 = vld [vmem:[#allocation6 + $0x180] sm:$0xff] }
  0xa0   :  { %1148 = vmatpush.msra.mxu0 %v5264_v37  ;;  %1236 = vmatpush.msra.mxu2 %v3800_v0  ;;  %v1313_v15 = vsub.f32 %v3871_v6, %v5265_v11  ;;  %v3926_v37 = vand.u32 4294901760, %v101_v36  ;;  %v3934_v11 = vsub.f32 %v102_v22, %v3910_v29  ;;  %v1336_v22 = vand.u32 4294901760, %v3921_v38 }
  0xa1   :  { %1195 = vmatpush.msra.mxu1 %v3578_v35  ;;  %1291 = vmatpush.msra.mxu3 %v1290_v21  ;;  %v1308_v35 = vand.u32 4294901760, %v1307_v63  ;;  %v5267_v21 = vand.u32 4294901760, %v3883_v30  ;;  %v5269_v63 = vand.u32 4294901760, %v3895_v59 }
  0xa2   :  { %1152 = vmatpush.msra.mxu0 %v5266_v25  ;;  %1238 = vmatpush.msra.mxu2 %v3817_v50  ;;  %v3939_v25 = vand.u32 4294901760, %v100_v17  ;;  %v3952_v44 = vsub.f32 %v101_v36, %v3926_v37 }
  0xa3   :  { %1197 = vmatpush.msra.mxu1 %v3588_v31  ;;  %1297 = vmatpush.msra.mxu3 %v1296_v16  ;;  %v1319_v60 = vsub.f32 %v3883_v30, %v5267_v21  ;;  %v3941_v31 = vand.u32 4294901760, %v191_v51  ;;  %v1314_v16 = vand.u32 4294901760, %v1313_v15  ;;  %v1325_v21 = vsub.f32 %v3895_v59, %v5269_v63 }
  0xa4   :  { %1156 = vmatpush.msra.mxu0 %v5268_v8  ;;  %1240 = vmatpush.msra.mxu2 %v3832_v42  ;;  %v3954_v8 = vand.u32 4294901760, %v99_v23  ;;  %v1342_v63 = vand.u32 4294901760, %v3934_v11  ;;  %v3965_v36 = vsub.f32 %v100_v17, %v3939_v25  ;;  %v1348_v24 = vand.u32 4294901760, %v3952_v44 }
  0xa5   :  { %1199 = vmatpush.msra.mxu1 %v3595_v62  ;;  %1303 = vmatpush.msra.mxu3 %v1302_v49  ;;  %v1320_v62 = vand.u32 4294901760, %v1319_v60  ;;  %v5271_v49 = vand.u32 4294901760, %v3908_v46  ;;  %v5273_v60 = vand.u32 4294901760, %v3717_v28 }
  0xa6   :  { %1160 = vmatpush.msra.mxu0 %v5270_v7  ;;  %1242 = vmatpush.msra.mxu2 %v3845_v43  ;;  %v3968_v7 = vsub.f32 %v191_v51, %v3941_v31  ;;  %v3979_v17 = vsub.f32 %v99_v23, %v3954_v8  ;;  %v1343_v51 = vsub.f32 %v3934_v11, %v1342_v63  ;;  %v1354_v28 = vand.u32 4294901760, %v3965_v36 }
  0xa7   :  { %1201 = vmatpush.msra.mxu1 %v3606_v61  ;;  %1309 = vmatpush.msra.mxu3 %v1308_v35  ;;  %v1331_v15 = vsub.f32 %v3908_v46, %v5271_v49  ;;  %v1326_v61 = vand.u32 4294901760, %v1325_v21  ;;  %v1337_v35 = vsub.f32 %v3921_v38, %v1336_v22 }
  0xa8   :  { %1164 = vmatpush.msra.mxu0 %v5272_v56  ;;  %1244 = vmatpush.msra.mxu2 %v3859_v9  ;;  %v1261_v21 = vand.u32 4294901760, %v3968_v7  ;;  %v1344_v49 = vand.u32 4294901760, %v1343_v51  ;;  %v121_v51 = vld [vmem:[#allocation6 + $0x230] sm:$0xff] }
  0xa9   :  { %1203 = vmatpush.msra.mxu1 %v3626_v48  ;;  %1315 = vmatpush.msra.mxu3 %v1314_v16  ;;  %v1332_v48 = vand.u32 4294901760, %v1331_v15  ;;  %v5274_v16 = vand.u32 4294901760, %v3730_v1  ;;  %v1338_v23 = vand.u32 4294901760, %v1337_v35  ;;  %v1349_v1 = vsub.f32 %v3952_v44, %v1348_v24 }
  0xaa   :  { %1168 = vmatpush.msra.mxu0 %v5273_v60  ;;  %1246 = vmatpush.msra.mxu2 %v3873_v32  ;;  %v5276_v15 = vand.u32 4294901760, %v3759_v52  ;;  %v122_v60 = vld [vmem:[#allocation6 + $0x238] sm:$0xff] }
  0xab   :  { %1205 = vmatpush.msra.mxu1 %v3639_v3  ;;  %1321 = vmatpush.msra.mxu3 %v1320_v62  ;;  %v5275_v3 = vand.u32 4294901760, %v3742_v20  ;;  %v1360_v62 = vand.u32 4294901760, %v3979_v17  ;;  %v1262_v20 = vsub.f32 %v3968_v7, %v1261_v21  ;;  %v1350_v52 = vand.u32 4294901760, %v1349_v1  ;;  %v120_v1 = vld [vmem:[#allocation6 + $0x228] sm:$0xff] }
  0xac   :  { %1172 = vmatpush.msra.mxu0 %v5274_v16  ;;  %1248 = vmatpush.msra.mxu2 %v3885_v41 }
  0xad   :  { %1207 = vmatpush.msra.mxu1 %v3650_v2  ;;  %1327 = vmatpush.msra.mxu3 %v1326_v61  ;;  %v1355_v2 = vsub.f32 %v3965_v36, %v1354_v28  ;;  %v1361_v56 = vsub.f32 %v3979_v17, %v1360_v62 }
  0xae   :  { %1176 = vmatpush.msra.mxu0 %v5275_v3  ;;  %1250 = vmatpush.msra.mxu2 %v3897_v4 }
  0xaf   :  { %1209 = vmatpush.msra.mxu1 %v3663_v33  ;;  %1333 = vmatpush.msra.mxu3 %v1332_v48  ;;  %v5277_v33 = vand.u32 4294901760, %v3781_v18  ;;  %v1356_v61 = vand.u32 4294901760, %v1355_v2  ;;  %v1362_v18 = vand.u32 4294901760, %v1361_v56  ;;  %v119_v2 = vld [vmem:[#allocation6 + $0x220] sm:$0xff] }
  0xb0   :  { %1180 = vmatpush.msra.mxu0 %v5276_v15  ;;  %1252 = vmatpush.msra.mxu2 %v3910_v29 }
  0xb1   :  { %1211 = vmatpush.msra.mxu1 %v3675_v34  ;;  %1339 = vmatpush.msra.mxu3 %v1338_v23  ;;  %v1263_v34 = vand.u32 4294901760, %v1262_v20  ;;  %v4160_v23 = vand.u32 4294901760, %v122_v60 }
  0xb2   :  { %1184 = vmatpush.msra.mxu0 %v5277_v33  ;;  %1254 = vmatpush.msra.mxu2 %v3926_v37  ;;  %v4185_v33 = vand.u32 4294901760, %v120_v1 }
  0xb3   :  { %1213 = vmatpush.msra.mxu1 %v3687_v53  ;;  %1345 = vmatpush.msra.mxu3 %v1344_v49  ;;  %v5278_v53 = vand.u32 4294901760, %v3774_v45  ;;  %v4173_v49 = vand.u32 4294901760, %v121_v51  ;;  %v4189_v56 = vsub.f32 %v122_v60, %v4160_v23 }
  0xb4   :  { %1186 = vmatmul.f32.vlgmr.msra.gmra.mxu0 %v3695_v57  ;;  %1256 = vmatpush.msra.mxu2 %v3939_v25 }
  0xb5   :  { %1371 = vmatpush.msrb.mxu0 %v3774_v45  ;;  %1215 = vmatpush.msra.mxu1 %v3701_v12  ;;  %v5279_v12 = vand.u32 4294901760, %v3795_v54 }
  0xb6   :  { %1351 = vmatpush.msra.mxu3 %v1350_v52  ;;  %1258 = vmatpush.msra.mxu2 %v3954_v8 }
  0xb7   :  { %1374 = vmatpush.msrb.mxu0 %v3795_v54  ;;  %1217 = vmatpush.msra.mxu1 %v3713_v27  ;;  %v5280_v27 = vand.u32 4294901760, %v3805_v39  ;;  %v5284_v54 = vand.u32 4294901760, %v3857_v26 }
  0xb8   :  { %1357 = vmatpush.msra.mxu3 %v1356_v61  ;;  %1264 = vmatmul.f32.vlgmr.msra.gmra.mxu2 %v1263_v34  ;;  %v118_v61 = vld [vmem:[#allocation6 + $0x218] sm:$0xff] }
  0xb9   :  { %1377 = vmatpush.msrb.mxu0 %v3805_v39  ;;  %1465 = vmatpush.msrb.mxu2 %v5278_v53  ;;  %v5286_v39 = vand.u32 4294901760, %v3883_v30 }
  0xba   :  { %1219 = vmatpush.msra.mxu1 %v3734_v5  ;;  %1363 = vmatpush.msra.mxu3 %v1362_v18  ;;  %v5281_v5 = vand.u32 4294901760, %v3813_v13  ;;  %v4197_v18 = vand.u32 4294901760, %v119_v2 }
  0xbb   :  { %1365 = vmatmul.f32.vlgmr.msra.gmra.mxu3 %v3941_v31  ;;  %1380 = vmatpush.msrb.mxu0 %v3813_v13 }
  0xbc   :  { %1469 = vmatpush.msrb.mxu2 %v5279_v12  ;;  %1532 = vmatpush.msrb.mxu3 %v3747_v10  ;;  %v4201_v12 = vsub.f32 %v121_v51, %v4173_v49 }
  0xbd   :  { %1221 = vmatpush.msra.mxu1 %v3753_v40  ;;  %1383 = vmatpush.msrb.mxu0 %v3824_v47  ;;  %v50_v40 = vld [vmem:[#allocation3 + $0x8] sm:$0xff] }
  0xbe   :  { %1223 = vmatmul.f32.vlgmr.msra.gmra.mxu1 %v3695_v57  ;;  %1473 = vmatpush.msrb.mxu2 %v5280_v27  ;;  %v5282_v57 = vand.u32 4294901760, %v3824_v47  ;;  %187 = vst [vmem:[#allocation1 + $0x20] ss:$4 sm:$0xff] %v50_v40  ;;  %v5288_v47 = vand.u32 4294901760, %v3908_v46  ;;  %v4211_v40 = vand.u32 4294901760, %v118_v61 }
  0xbf   :  { %1424 = vmatpush.msrb.mxu1 %v3747_v10  ;;  %1534 = vmatpush.msrb.mxu3 %v3766_v55  ;;  %v5283_v10 = vand.u32 4294901760, %v3843_v58 }
  0xc0   :  { %1386 = vmatpush.msrb.mxu0 %v3843_v58  ;;  %1477 = vmatpush.msrb.mxu2 %v5281_v5  ;;  %v117_v5 = vld [vmem:[#allocation6 + $0x210] sm:$0xff] }
  0xc1   :  { %1426 = vmatpush.msrb.mxu1 %v3766_v55  ;;  %1536 = vmatpush.msrb.mxu3 %v3783_v14  ;;  %v130_v55 = vld [vmem:[#allocation6 + $0x278] sm:$0xff] }
  0xc2   :  { %1389 = vmatpush.msrb.mxu0 %v3857_v26  ;;  %1481 = vmatpush.msrb.mxu2 %v5282_v57  ;;  %v4074_v45 = vand.u32 4294901760, %v130_v55 }
  0xc3   :  { %1428 = vmatpush.msrb.mxu1 %v3783_v14  ;;  %1538 = vmatpush.msrb.mxu3 %v3788_v19  ;;  %v5285_v14 = vand.u32 4294901760, %v3871_v6 }
  0xc4   :  { %1392 = vmatpush.msrb.mxu0 %v3871_v6  ;;  %1485 = vmatpush.msrb.mxu2 %v5283_v10  ;;  %v129_v6 = vld [vmem:[#allocation6 + $0x270] sm:$0xff]  ;;  %v4091_v58 = vsub.f32 %v130_v55, %v4074_v45 }
  0xc5   :  { %1430 = vmatpush.msrb.mxu1 %v3788_v19  ;;  %1540 = vmatpush.msrb.mxu3 %v3800_v0  ;;  %v128_v19 = vld [vmem:[#allocation6 + $0x268] sm:$0xff]  ;;  %v4081_v13 = vand.u32 4294901760, %v129_v6 }
  0xc6   :  { %1395 = vmatpush.msrb.mxu0 %v3883_v30  ;;  %1489 = vmatpush.msrb.mxu2 %v5284_v54  ;;  %v5186_v54 = vand.u32 4294901760, %v4189_v56 }
  0xc7   :  { %1432 = vmatpush.msrb.mxu1 %v3800_v0  ;;  %1542 = vmatpush.msrb.mxu3 %v3817_v50  ;;  %v5287_v0 = vand.u32 4294901760, %v3895_v59 }
  0xc8   :  { %1398 = vmatpush.msrb.mxu0 %v3895_v59  ;;  %1493 = vmatpush.msrb.mxu2 %v5285_v14  ;;  %v4215_v14 = vsub.f32 %v120_v1, %v4185_v33 }
  0xc9   :  { %1434 = vmatpush.msrb.mxu1 %v3817_v50  ;;  %1544 = vmatpush.msrb.mxu3 %v3832_v42  ;;  %v127_v50 = vld [vmem:[#allocation6 + $0x260] sm:$0xff] }
  0xca   :  { %1401 = vmatpush.msrb.mxu0 %v3908_v46  ;;  %1497 = vmatpush.msrb.mxu2 %v5286_v39  ;;  %v4098_v26 = vand.u32 4294901760, %v127_v50 }
  0xcb   :  { %1436 = vmatpush.msrb.mxu1 %v3832_v42  ;;  %1546 = vmatpush.msrb.mxu3 %v3845_v43  ;;  %v4088_v42 = vand.u32 4294901760, %v128_v19 }
  0xcc   :  { %1404 = vmatpush.msrb.mxu0 %v3921_v38  ;;  %1501 = vmatpush.msrb.mxu2 %v5287_v0  ;;  %v124_v38 = vld [vmem:[#allocation6 + $0x248] sm:$0xff]  ;;  %v4223_v0 = vand.u32 4294901760, %v117_v5 }
  0xcd   :  { %1438 = vmatpush.msrb.mxu1 %v3845_v43  ;;  %1548 = vmatpush.msrb.mxu3 %v3859_v9  ;;  %v126_v43 = vld [vmem:[#allocation6 + $0x258] sm:$0xff]  ;;  %v4112_v59 = vsub.f32 %v128_v19, %v4088_v42  ;;  %v116_v19 = vld [vmem:[#allocation6 + $0x208] sm:$0xff] }
  0xce   :  { %1407 = vmatpush.msrb.mxu0 %v3934_v11  ;;  %1505 = vmatpush.msrb.mxu2 %v5288_v47  ;;  %v4106_v30 = vand.u32 4294901760, %v126_v43  ;;  %v4123_v11 = vsub.f32 %v127_v50, %v4098_v26  ;;  %v4227_v47 = vsub.f32 %v119_v2, %v4197_v18  ;;  %v4244_v60 = vand.u32 4294901760, %v116_v19 }
  0xcf   :  { %1440 = vmatpush.msrb.mxu1 %v3859_v9  ;;  %1550 = vmatpush.msrb.mxu3 %v3873_v32  ;;  %v4101_v9 = vsub.f32 %v129_v6, %v4081_v13  ;;  %v5185_v6 = vand.u32 4294901760, %v4201_v12  ;;  %v4252_v1 = vsub.f32 %v117_v5, %v4223_v0 }
  0xd0   :  { %1410 = vmatpush.msrb.mxu0 %v3952_v44  ;;  %1509 = vmatpush.msrb.mxu2 %v1336_v22  ;;  %v4129_v22 = vsub.f32 %v126_v43, %v4106_v30  ;;  %v123_v44 = vld [vmem:[#allocation6 + $0x240] sm:$0xff] }
  0xd1   :  { %1442 = vmatpush.msrb.mxu1 %v3873_v32  ;;  %1552 = vmatpush.msrb.mxu3 %v3885_v41  ;;  %v125_v32 = vld [vmem:[#allocation6 + $0x250] sm:$0xff] }
  0xd2   :  { %1413 = vmatpush.msrb.mxu0 %v3965_v36  ;;  %1513 = vmatpush.msrb.mxu2 %v1342_v63  ;;  %v4117_v46 = vand.u32 4294901760, %v125_v32  ;;  %v4136_v63 = vand.u32 4294901760, %v124_v38  ;;  %v1623_v36 = vand.u32 4294901760, %v4112_v59  ;;  %v5191_v48 = vand.u32 4294901760, %v4129_v22 }
  0xd3   :  { %1444 = vmatpush.msrb.mxu1 %v3885_v41  ;;  %1554 = vmatpush.msrb.mxu3 %v3897_v4  ;;  %v1611_v41 = vand.u32 4294901760, %v4091_v58 }
  0xd4   :  { %1416 = vmatpush.msrb.mxu0 %v3979_v17  ;;  %1517 = vmatpush.msrb.mxu2 %v1348_v24  ;;  %v4142_v35 = vsub.f32 %v125_v32, %v4117_v46  ;;  %v4149_v24 = vand.u32 4294901760, %v123_v44  ;;  %v5194_v17 = vand.u32 4294901760, %v4123_v11  ;;  %v4163_v3 = vsub.f32 %v124_v38, %v4136_v63 }
  0xd5   :  { %1446 = vmatpush.msrb.mxu1 %v3897_v4  ;;  %1556 = vmatpush.msrb.mxu3 %v3910_v29  ;;  %v1617_v4 = vand.u32 4294901760, %v4101_v9  ;;  %v1660_v32 = vsub.f32 %v4189_v56, %v5186_v54  ;;  %v5183_v38 = vand.u32 4294901760, %v4215_v14 }
  0xd6   :  { %1419 = vmatmul.f32.vlgmr.msrb.gmra.mxu0 %v3968_v7  ;;  %1521 = vmatpush.msrb.mxu2 %v1354_v28  ;;  %v1624_v28 = vsub.f32 %v4112_v59, %v1623_v36  ;;  %v4176_v15 = vsub.f32 %v123_v44, %v4149_v24  ;;  %v5188_v52 = vand.u32 4294901760, %v4163_v3  ;;  %v192_v7 = vld.sshfl [vmem:[#allocation1 + $0x20] sm:$0xff pattern:$0x73625140]  ;;  %v4240_v44 = vsub.f32 %v118_v61, %v4211_v40 }
  0xd7   :  { %1569 = vmatpush.msra.mxu0 %v4074_v45  ;;  %1448 = vmatpush.msrb.mxu1 %v3910_v29  ;;  %v1612_v29 = vsub.f32 %v4091_v58, %v1611_v41  ;;  %v4205_v57 = vand.u32 4294901760, %v192_v7  ;;  %v1661_v2 = vand.u32 4294901760, %v1660_v32  ;;  %v4269_v61 = vsub.f32 %v116_v19, %v4244_v60 }
  0xd8   :  { %1558 = vmatpush.msrb.mxu3 %v3926_v37  ;;  %1525 = vmatpush.msrb.mxu2 %v1360_v62  ;;  %v1630_v62 = vsub.f32 %v4123_v11, %v5194_v17  ;;  %v1625_v20 = vand.u32 4294901760, %v1624_v28  ;;  %v5187_v53 = vand.u32 4294901760, %v4176_v15  ;;  %v1648_v10 = vsub.f32 %v4163_v3, %v5188_v52  ;;  %v138_v17 = vld [vmem:[#allocation6 + $0x2b8] sm:$0xff] }
  0xd9   :  { %1571 = vmatpush.msra.mxu0 %v4081_v13  ;;  %1450 = vmatpush.msrb.mxu1 %v3926_v37  ;;  %v1618_v37 = vsub.f32 %v4101_v9, %v1617_v4  ;;  %v1613_v16 = vand.u32 4294901760, %v1612_v29  ;;  %v4232_v50 = vsub.f32 %v192_v7, %v4205_v57  ;;  %v146_v29 = vld [vmem:[#allocation6 + $0x2f8] sm:$0xff]  ;;  %v5182_v28 = vand.u32 4294901760, %v4227_v47 }
  0xda   :  { %1560 = vmatpush.msrb.mxu3 %v3939_v25  ;;  %1527 = vmatmul.f32.vlgmr.msrb.gmra.mxu2 %v3941_v31  ;;  %v1631_v34 = vand.u32 4294901760, %v1630_v62  ;;  %v1654_v55 = vsub.f32 %v4176_v15, %v5187_v53  ;;  %v1649_v43 = vand.u32 4294901760, %v1648_v10  ;;  %v4257_v62 = vand.u32 4294901760, %v146_v29 }
  0xdb   :  { %1573 = vmatpush.msra.mxu0 %v4088_v42  ;;  %1712 = vmatpush.msra.mxu2 %v4091_v58  ;;  %v1678_v5 = vsub.f32 %v4227_v47, %v5182_v28  ;;  %v5189_v10 = vand.u32 4294901760, %v4252_v1 }
  0xdc   :  { %1452 = vmatpush.msrb.mxu1 %v3939_v25  ;;  %1562 = vmatpush.msrb.mxu3 %v3954_v8  ;;  %v5190_v25 = vand.u32 4294901760, %v4142_v35  ;;  %v1655_v51 = vand.u32 4294901760, %v1654_v55  ;;  %v143_v55 = vld [vmem:[#allocation6 + $0x2e0] sm:$0xff] }
  0xdd   :  { %1564 = vmatmul.f32.vlgmr.msrb.gmra.mxu3 %v3941_v31  ;;  %1575 = vmatpush.msra.mxu0 %v4098_v26  ;;  %v1619_v31 = vand.u32 4294901760, %v1618_v37  ;;  %v115_v37 = vld [vmem:[#allocation6 + $0x200] sm:$0xff] }
  0xde   :  { %1715 = vmatpush.msra.mxu2 %v4101_v9  ;;  %1765 = vmatpush.msra.mxu3 %v4074_v45  ;;  %v4263_v7 = vand.u32 4294901760, %v115_v37 }
  0xdf   :  { %1454 = vmatpush.msrb.mxu1 %v3954_v8  ;;  %1577 = vmatpush.msra.mxu0 %v4106_v30  ;;  %v1636_v8 = vsub.f32 %v4129_v22, %v5191_v48 }
  0xe0   :  { %1458 = vmatmul.f32.vlgmr.msrb.gmra.mxu1 %v1261_v21  ;;  %1718 = vmatpush.msra.mxu2 %v4112_v59  ;;  %v1642_v21 = vsub.f32 %v4142_v35, %v5190_v25 }
  0xe1   :  { %1614 = vmatpush.msra.mxu1 %v1613_v16  ;;  %1767 = vmatpush.msra.mxu3 %v4081_v13  ;;  %v1637_v27 = vand.u32 4294901760, %v1636_v8  ;;  %v1666_v16 = vsub.f32 %v4201_v12, %v5185_v6  ;;  %v145_v8 = vld [vmem:[#allocation6 + $0x2f0] sm:$0xff] }
  0xe2   :  { %1579 = vmatpush.msra.mxu0 %v4117_v46  ;;  %1721 = vmatpush.msra.mxu2 %v4123_v11  ;;  %v1643_v39 = vand.u32 4294901760, %v1642_v21  ;;  %v5184_v21 = vand.u32 4294901760, %v4240_v44 }
  0xe3   :  { %1620 = vmatpush.msra.mxu1 %v1619_v31  ;;  %1769 = vmatpush.msra.mxu3 %v4088_v42  ;;  %v5196_v31 = vand.u32 4294901760, %v4232_v50 }
  0xe4   :  { %1581 = vmatpush.msra.mxu0 %v4136_v63  ;;  %1724 = vmatpush.msra.mxu2 %v4129_v22 }
  0xe5   :  { %1626 = vmatpush.msra.mxu1 %v1625_v20  ;;  %1771 = vmatpush.msra.mxu3 %v4098_v26  ;;  %v1672_v20 = vsub.f32 %v4215_v14, %v5183_v38  ;;  %v1603_v19 = vsub.f32 %v4232_v50, %v5196_v31  ;;  %v142_v38 = vld [vmem:[#allocation6 + $0x2d8] sm:$0xff]  ;;  %v137_v31 = vld [vmem:[#allocation6 + $0x2b0] sm:$0xff] }
  0xe6   :  { %1583 = vmatpush.msra.mxu0 %v4149_v24  ;;  %1727 = vmatpush.msra.mxu2 %v4142_v35  ;;  %v4310_v53 = vand.u32 4294901760, %v142_v38 }
  0xe7   :  { %1632 = vmatpush.msra.mxu1 %v1631_v34  ;;  %1773 = vmatpush.msra.mxu3 %v4106_v30  ;;  %v144_v34 = vld [vmem:[#allocation6 + $0x2e8] sm:$0xff]  ;;  %v1673_v32 = vand.u32 4294901760, %v1672_v20  ;;  %v1679_v20 = vand.u32 4294901760, %v1678_v5  ;;  %v1604_v6 = vand.u32 4294901760, %v1603_v19 }
  0xe8   :  { %1585 = vmatpush.msra.mxu0 %v4160_v23  ;;  %1730 = vmatpush.msra.mxu2 %v4163_v3  ;;  %v4293_v28 = vand.u32 4294901760, %v144_v34 }
  0xe9   :  { %1638 = vmatpush.msra.mxu1 %v1637_v27  ;;  %1775 = vmatpush.msra.mxu3 %v4117_v46  ;;  %v1667_v27 = vand.u32 4294901760, %v1666_v16  ;;  %v4291_v16 = vsub.f32 %v115_v37, %v4263_v7  ;;  %v1690_v37 = vsub.f32 %v4252_v1, %v5189_v10 }
  0xea   :  { %1587 = vmatpush.msra.mxu0 %v4173_v49  ;;  %1733 = vmatpush.msra.mxu2 %v4176_v15  ;;  %v4315_v10 = vsub.f32 %v144_v34, %v4293_v28 }
  0xeb   :  { %1644 = vmatpush.msra.mxu1 %v1643_v39  ;;  %1777 = vmatpush.msra.mxu3 %v4136_v63  ;;  %v4276_v39 = vand.u32 4294901760, %v145_v8  ;;  %v5195_v52 = vand.u32 4294901760, %v4291_v16 }
  0xec   :  { %1589 = vmatpush.msra.mxu0 %v4185_v33  ;;  %1736 = vmatpush.msra.mxu2 %v4189_v56 }
  0xed   :  { %1650 = vmatpush.msra.mxu1 %v1649_v43  ;;  %1779 = vmatpush.msra.mxu3 %v4149_v24  ;;  %v4284_v43 = vsub.f32 %v146_v29, %v4257_v62  ;;  %v5192_v29 = vand.u32 4294901760, %v4269_v61 }
  0xee   :  { %1591 = vmatpush.msra.mxu0 %v4197_v18  ;;  %1739 = vmatpush.msra.mxu2 %v4201_v12 }
  0xef   :  { %1656 = vmatpush.msra.mxu1 %v1655_v51  ;;  %1781 = vmatpush.msra.mxu3 %v4160_v23  ;;  %v1684_v51 = vsub.f32 %v4240_v44, %v5184_v21  ;;  %v4305_v21 = vsub.f32 %v145_v8, %v4276_v39  ;;  %v5193_v54 = vand.u32 4294901760, %v4284_v43  ;;  %v1696_v8 = vsub.f32 %v4269_v61, %v5192_v29 }
  0xf0   :  { %1593 = vmatpush.msra.mxu0 %v4211_v40  ;;  %1742 = vmatpush.msra.mxu2 %v4215_v14  ;;  %v4334_v29 = vsub.f32 %v142_v38, %v4310_v53 }
  0xf1   :  { %1662 = vmatpush.msra.mxu1 %v1661_v2  ;;  %1783 = vmatpush.msra.mxu3 %v4173_v49  ;;  %v4298_v2 = vand.u32 4294901760, %v143_v55  ;;  %v1685_v5 = vand.u32 4294901760, %v1684_v51  ;;  %v1691_v51 = vand.u32 4294901760, %v1690_v37  ;;  %v5198_v25 = vand.u32 4294901760, %v4305_v21 }
  0xf2   :  { %1595 = vmatpush.msra.mxu0 %v4223_v0  ;;  %1745 = vmatpush.msra.mxu2 %v4227_v47  ;;  %v1953_v48 = vsub.f32 %v4284_v43, %v5193_v54  ;;  %v1697_v54 = vand.u32 4294901760, %v1696_v8 }
  0xf3   :  { %1668 = vmatpush.msra.mxu1 %v1667_v27  ;;  %1785 = vmatpush.msra.mxu3 %v4185_v33  ;;  %v141_v27 = vld [vmem:[#allocation6 + $0x2d0] sm:$0xff]  ;;  %v4323_v19 = vsub.f32 %v143_v55, %v4298_v2  ;;  %v139_v55 = vld [vmem:[#allocation6 + $0x2c0] sm:$0xff]  ;;  %v1959_v58 = vsub.f32 %v4305_v21, %v5198_v25 }
  0xf4   :  { %1597 = vmatpush.msra.mxu0 %v4244_v60  ;;  %1748 = vmatpush.msra.mxu2 %v4240_v44  ;;  %v4327_v34 = vand.u32 4294901760, %v141_v27  ;;  %v1954_v8 = vand.u32 4294901760, %v1953_v48  ;;  %v5289_v48 = vand.u32 4294901760, %v4232_v50 }
  0xf5   :  { %1674 = vmatpush.msra.mxu1 %v1673_v32  ;;  %1787 = vmatpush.msra.mxu3 %v4197_v18  ;;  %v140_v32 = vld [vmem:[#allocation6 + $0x2c8] sm:$0xff]  ;;  %v5199_v38 = vand.u32 4294901760, %v4323_v19 }
  0xf6   :  { %1599 = vmatpush.msra.mxu0 %v4263_v7  ;;  %1751 = vmatpush.msra.mxu2 %v4252_v1  ;;  %v4342_v37 = vand.u32 4294901760, %v140_v32 }
  0xf7   :  { %1680 = vmatpush.msra.mxu1 %v1679_v20  ;;  %1789 = vmatpush.msra.mxu3 %v4211_v40  ;;  %v1702_v20 = vsub.f32 %v4291_v16, %v5195_v52  ;;  %v5200_v52 = vand.u32 4294901760, %v4334_v29  ;;  %v1971_v59 = vsub.f32 %v4323_v19, %v5199_v38 }
  0xf8   :  { %1605 = vmatmul.f32.vlgmr.msra.gmra.mxu0 %v1604_v6  ;;  %1754 = vmatpush.msra.mxu2 %v4269_v61  ;;  %v5197_v6 = vand.u32 4294901760, %v4315_v10 }
  0xf9   :  { %1806 = vmatpush.msrb.mxu0 %v1611_v41  ;;  %1686 = vmatpush.msra.mxu1 %v1685_v5  ;;  %v4353_v41 = vsub.f32 %v141_v27, %v4327_v34  ;;  %v4355_v5 = vand.u32 4294901760, %v139_v55  ;;  %v1703_v9 = vand.u32 4294901760, %v1702_v20  ;;  %v4367_v27 = vsub.f32 %v140_v32, %v4342_v37  ;;  %v134_v32 = vld [vmem:[#allocation6 + $0x298] sm:$0xff] }
  0xfa   :  { %1791 = vmatpush.msra.mxu3 %v4223_v0  ;;  %1757 = vmatpush.msra.mxu2 %v4291_v16  ;;  %v5290_v20 = vand.u32 4294901760, %v4123_v11  ;;  %v1977_v38 = vsub.f32 %v4334_v29, %v5200_v52  ;;  %v5291_v11 = vand.u32 4294901760, %v4129_v22  ;;  %v5293_v52 = vand.u32 4294901760, %v4142_v35 }
  0xfb   :  { %1810 = vmatpush.msrb.mxu0 %v1617_v4  ;;  %1692 = vmatpush.msra.mxu1 %v1691_v51  ;;  %v1965_v4 = vsub.f32 %v4315_v10, %v5197_v6  ;;  %v4369_v51 = vand.u32 4294901760, %v138_v17  ;;  %v1960_v6 = vand.u32 4294901760, %v1959_v58  ;;  %v4381_v25 = vsub.f32 %v139_v55, %v4355_v5 }
  0xfc   :  { %1793 = vmatpush.msra.mxu3 %v4244_v60  ;;  %1760 = vmatmul.f32.vlgmr.msra.gmra.mxu2 %v4232_v50  ;;  %v135_v50 = vld [vmem:[#allocation6 + $0x2a0] sm:$0xff]  ;;  %v5292_v22 = vand.u32 4294901760, %v4353_v41  ;;  %v5294_v35 = vand.u32 4294901760, %v4163_v3  ;;  %v5296_v3 = vand.u32 4294901760, %v4176_v15  ;;  %v5298_v15 = vand.u32 4294901760, %v4189_v56 }
  0xfd   :  { %1814 = vmatpush.msrb.mxu0 %v1623_v36  ;;  %1910 = vmatpush.msrb.mxu2 %v4257_v62  ;;  %v136_v36 = vld [vmem:[#allocation6 + $0x2a8] sm:$0xff]  ;;  %v1966_v58 = vand.u32 4294901760, %v1965_v4  ;;  %v4393_v55 = vsub.f32 %v138_v17, %v4369_v51  ;;  %v133_v4 = vld [vmem:[#allocation6 + $0x290] sm:$0xff] }
  0xfe   :  { %1698 = vmatpush.msra.mxu1 %v1697_v54  ;;  %1795 = vmatpush.msra.mxu3 %v4263_v7  ;;  %v4383_v54 = vand.u32 4294901760, %v137_v31 }
  0xff   :  { %1799 = vmatmul.f32.vlgmr.msra.gmra.mxu3 %v5289_v48  ;;  %1818 = vmatpush.msrb.mxu0 %v5290_v20  ;;  %v5201_v48 = vand.u32 4294901760, %v4367_v27  ;;  %v4395_v20 = vand.u32 4294901760, %v136_v36 }
 0x100   :  { %1912 = vmatpush.msrb.mxu2 %v4276_v39  ;;  %1955 = vmatpush.msrb.mxu3 %v1954_v8  ;;  %v1972_v8 = vand.u32 4294901760, %v1971_v59  ;;  %v4405_v17 = vsub.f32 %v137_v31, %v4383_v54  ;;  %v1978_v59 = vand.u32 4294901760, %v1977_v38 }
 0x101   :  { %1704 = vmatpush.msra.mxu1 %v1703_v9  ;;  %1822 = vmatpush.msrb.mxu0 %v5291_v11  ;;  %v1983_v9 = vsub.f32 %v4353_v41, %v5292_v22  ;;  %v4407_v11 = vand.u32 4294901760, %v135_v50  ;;  %v4418_v31 = vsub.f32 %v136_v36, %v4395_v20  ;;  %v4420_v22 = vand.u32 4294901760, %v134_v32 }
 0x102   :  { %1706 = vmatmul.f32.vlgmr.msra.gmra.mxu1 %v4205_v57  ;;  %1914 = vmatpush.msrb.mxu2 %v4293_v28 }
 0x103   :  { %1873 = vmatpush.msrb.mxu1 %v4074_v45  ;;  %1961 = vmatpush.msrb.mxu3 %v1960_v6  ;;  %v1989_v45 = vsub.f32 %v4367_v27, %v5201_v48  ;;  %v4431_v36 = vsub.f32 %v135_v50, %v4407_v11  ;;  %v132_v48 = vld [vmem:[#allocation6 + $0x288] sm:$0xff]  ;;  %v193_v6 = vld.sshfl [vmem:[#allocation1 + $0x28] sm:$0xff pattern:$0x73625140]  ;;  %v5300_v50 = vand.u32 4294901760, %v4201_v12  ;;  %v5302_v12 = vand.u32 4294901760, %v4215_v14 }
 0x104   :  { %1826 = vmatpush.msrb.mxu0 %v5293_v52  ;;  %1916 = vmatpush.msrb.mxu2 %v4298_v2  ;;  %v5295_v52 = vand.u32 4294901760, %v4381_v25 }
 0x105   :  { %1875 = vmatpush.msrb.mxu1 %v4081_v13  ;;  %1967 = vmatpush.msrb.mxu3 %v1966_v58  ;;  %v1984_v13 = vand.u32 4294901760, %v1983_v9  ;;  %v131_v58 = vld [vmem:[#allocation6 + $0x280] sm:$0xff] }
 0x106   :  { %1830 = vmatpush.msrb.mxu0 %v5294_v35  ;;  %1918 = vmatpush.msrb.mxu2 %v4310_v53  ;;  %v1995_v38 = vsub.f32 %v4381_v25, %v5295_v52  ;;  %v4436_v35 = vand.u32 4294901760, %v133_v4  ;;  %v4444_v52 = vsub.f32 %v134_v32, %v4420_v22  ;;  %v2018_v32 = vand.u32 4294901760, %v4431_v36 }
 0x107   :  { %1877 = vmatpush.msrb.mxu1 %v4088_v42  ;;  %1973 = vmatpush.msrb.mxu3 %v1972_v8  ;;  %v1990_v42 = vand.u32 4294901760, %v1989_v45  ;;  %v5297_v8 = vand.u32 4294901760, %v4393_v55  ;;  %v5299_v45 = vand.u32 4294901760, %v4405_v17 }
 0x108   :  { %1834 = vmatpush.msrb.mxu0 %v5296_v3  ;;  %1920 = vmatpush.msrb.mxu2 %v4327_v34  ;;  %v4449_v3 = vand.u32 4294901760, %v132_v48  ;;  %v4462_v56 = vsub.f32 %v133_v4, %v4436_v35 }
 0x109   :  { %1879 = vmatpush.msrb.mxu1 %v4098_v26  ;;  %1979 = vmatpush.msrb.mxu3 %v1978_v59  ;;  %v2001_v9 = vsub.f32 %v4393_v55, %v5297_v8  ;;  %v4451_v26 = vand.u32 4294901760, %v193_v6  ;;  %v1996_v59 = vand.u32 4294901760, %v1995_v38  ;;  %v2007_v8 = vsub.f32 %v4405_v17, %v5299_v45 }
 0x10a   :  { %1838 = vmatpush.msrb.mxu0 %v5298_v15  ;;  %1922 = vmatpush.msrb.mxu2 %v4342_v37  ;;  %v4464_v15 = vand.u32 4294901760, %v131_v58  ;;  %v2024_v45 = vand.u32 4294901760, %v4444_v52  ;;  %v4475_v4 = vsub.f32 %v132_v48, %v4449_v3  ;;  %v2030_v14 = vand.u32 4294901760, %v4462_v56 }
 0x10b   :  { %1881 = vmatpush.msrb.mxu1 %v4106_v30  ;;  %1985 = vmatpush.msrb.mxu3 %v1984_v13  ;;  %v2002_v30 = vand.u32 4294901760, %v2001_v9  ;;  %v5301_v13 = vand.u32 4294901760, %v4418_v31  ;;  %v5303_v9 = vand.u32 4294901760, %v4227_v47 }
 0x10c   :  { %1842 = vmatpush.msrb.mxu0 %v5300_v50  ;;  %1924 = vmatpush.msrb.mxu2 %v4355_v5  ;;  %v4478_v50 = vsub.f32 %v193_v6, %v4451_v26  ;;  %v4489_v48 = vsub.f32 %v131_v58, %v4464_v15  ;;  %v2025_v6 = vsub.f32 %v4444_v52, %v2024_v45  ;;  %v2036_v47 = vand.u32 4294901760, %v4475_v4 }
 0x10d   :  { %1883 = vmatpush.msrb.mxu1 %v4117_v46  ;;  %1991 = vmatpush.msrb.mxu3 %v1990_v42  ;;  %v2013_v38 = vsub.f32 %v4418_v31, %v5301_v13  ;;  %v2008_v46 = vand.u32 4294901760, %v2007_v8  ;;  %v2019_v42 = vsub.f32 %v4431_v36, %v2018_v32 }
 0x10e   :  { %1846 = vmatpush.msrb.mxu0 %v5302_v12  ;;  %1926 = vmatpush.msrb.mxu2 %v4369_v51  ;;  %v1943_v8 = vand.u32 4294901760, %v4478_v50  ;;  %v2026_v13 = vand.u32 4294901760, %v2025_v6 }
 0x10f   :  { %1885 = vmatpush.msrb.mxu1 %v4136_v63  ;;  %1997 = vmatpush.msrb.mxu3 %v1996_v59  ;;  %v2014_v63 = vand.u32 4294901760, %v2013_v38  ;;  %v5304_v59 = vand.u32 4294901760, %v4240_v44  ;;  %v2020_v58 = vand.u32 4294901760, %v2019_v42  ;;  %v2031_v44 = vsub.f32 %v4462_v56, %v2030_v14  ;;  %v154_v42 = vld [vmem:[#allocation6 + $0x338] sm:$0xff] }
 0x110   :  { %1850 = vmatpush.msrb.mxu0 %v5303_v9  ;;  %1928 = vmatpush.msrb.mxu2 %v4383_v54  ;;  %v5306_v38 = vand.u32 4294901760, %v4269_v61 }
 0x111   :  { %1887 = vmatpush.msrb.mxu1 %v4149_v24  ;;  %2003 = vmatpush.msrb.mxu3 %v2002_v30  ;;  %v5305_v24 = vand.u32 4294901760, %v4252_v1  ;;  %v2042_v30 = vand.u32 4294901760, %v4489_v48  ;;  %v1944_v1 = vsub.f32 %v4478_v50, %v1943_v8  ;;  %v2032_v61 = vand.u32 4294901760, %v2031_v44 }
 0x112   :  { %1854 = vmatpush.msrb.mxu0 %v5304_v59  ;;  %1930 = vmatpush.msrb.mxu2 %v4395_v20 }
 0x113   :  { %1889 = vmatpush.msrb.mxu1 %v4160_v23  ;;  %2009 = vmatpush.msrb.mxu3 %v2008_v46  ;;  %v2037_v23 = vsub.f32 %v4475_v4, %v2036_v47  ;;  %v2043_v12 = vsub.f32 %v4489_v48, %v2042_v30 }
 0x114   :  { %1858 = vmatpush.msrb.mxu0 %v5305_v24  ;;  %1932 = vmatpush.msrb.mxu2 %v4407_v11  ;;  %v152_v24 = vld [vmem:[#allocation6 + $0x328] sm:$0xff] }
 0x115   :  { %1891 = vmatpush.msrb.mxu1 %v4173_v49  ;;  %2015 = vmatpush.msrb.mxu3 %v2014_v63  ;;  %v5307_v49 = vand.u32 4294901760, %v4291_v16  ;;  %v2038_v46 = vand.u32 4294901760, %v2037_v23  ;;  %v2044_v16 = vand.u32 4294901760, %v2043_v12  ;;  %v153_v63 = vld [vmem:[#allocation6 + $0x330] sm:$0xff]  ;;  %v150_v12 = vld [vmem:[#allocation6 + $0x318] sm:$0xff] }
 0x116   :  { %1862 = vmatpush.msrb.mxu0 %v5306_v38  ;;  %1934 = vmatpush.msrb.mxu2 %v4420_v22  ;;  %v151_v38 = vld [vmem:[#allocation6 + $0x320] sm:$0xff] }
 0x117   :  { %1893 = vmatpush.msrb.mxu1 %v4185_v33  ;;  %2021 = vmatpush.msrb.mxu3 %v2020_v58  ;;  %v1945_v33 = vand.u32 4294901760, %v1944_v1  ;;  %v4695_v1 = vand.u32 4294901760, %v152_v24 }
 0x118   :  { %1866 = vmatpush.msrb.mxu0 %v5307_v49  ;;  %1936 = vmatpush.msrb.mxu2 %v4436_v35 }
 0x119   :  { %1895 = vmatpush.msrb.mxu1 %v4197_v18  ;;  %2027 = vmatpush.msrb.mxu3 %v2026_v13  ;;  %v5308_v18 = vand.u32 4294901760, %v4284_v43 }
 0x11a   :  { %1868 = vmatmul.f32.vlgmr.msrb.gmra.mxu0 %v4205_v57  ;;  %1938 = vmatpush.msrb.mxu2 %v4449_v3 }
 0x11b   :  { %2053 = vmatpush.msra.mxu0 %v4284_v43  ;;  %1897 = vmatpush.msrb.mxu1 %v4211_v40  ;;  %v5309_v40 = vand.u32 4294901760, %v4305_v21  ;;  %v5318_v43 = vand.u32 4294901760, %v4418_v31 }
 0x11c   :  { %2033 = vmatpush.msrb.mxu3 %v2032_v61  ;;  %1940 = vmatpush.msrb.mxu2 %v4464_v15 }
 0x11d   :  { %2056 = vmatpush.msra.mxu0 %v4305_v21  ;;  %1899 = vmatpush.msrb.mxu1 %v4223_v0  ;;  %v5310_v0 = vand.u32 4294901760, %v4315_v10  ;;  %v5316_v21 = vand.u32 4294901760, %v4393_v55 }
 0x11e   :  { %2039 = vmatpush.msrb.mxu3 %v2038_v46  ;;  %1946 = vmatmul.f32.vlgmr.msrb.gmra.mxu2 %v1945_v33  ;;  %v4707_v33 = vand.u32 4294901760, %v151_v38 }
 0x11f   :  { %2059 = vmatpush.msra.mxu0 %v4315_v10  ;;  %2147 = vmatpush.msra.mxu2 %v5308_v18  ;;  %v162_v10 = vld [vmem:[#allocation6 + $0x378] sm:$0xff] }
 0x120   :  { %1901 = vmatpush.msrb.mxu1 %v4244_v60  ;;  %2045 = vmatpush.msrb.mxu3 %v2044_v16  ;;  %v5311_v60 = vand.u32 4294901760, %v4323_v19 }
 0x121   :  { %2047 = vmatmul.f32.vlgmr.msrb.gmra.mxu3 %v4451_v26  ;;  %2062 = vmatpush.msra.mxu0 %v4323_v19  ;;  %v159_v19 = vld [vmem:[#allocation6 + $0x360] sm:$0xff] }
 0x122   :  { %2151 = vmatpush.msra.mxu2 %v5309_v40  ;;  %2214 = vmatpush.msra.mxu3 %v4257_v62 }
 0x123   :  { %1903 = vmatpush.msrb.mxu1 %v4263_v7  ;;  %2065 = vmatpush.msra.mxu0 %v4334_v29  ;;  %v5314_v7 = vand.u32 4294901760, %v4367_v27 }
 0x124   :  { %1905 = vmatmul.f32.vlgmr.msrb.gmra.mxu1 %v4205_v57  ;;  %2155 = vmatpush.msra.mxu2 %v5310_v0  ;;  %v5312_v57 = vand.u32 4294901760, %v4334_v29  ;;  %v160_v29 = vld [vmem:[#allocation6 + $0x368] sm:$0xff]  ;;  %v149_v0 = vld [vmem:[#allocation6 + $0x310] sm:$0xff] }
 0x125   :  { %2106 = vmatpush.msra.mxu1 %v4257_v62  ;;  %2216 = vmatpush.msra.mxu3 %v4276_v39  ;;  %v5313_v62 = vand.u32 4294901760, %v4353_v41 }
 0x126   :  { %2068 = vmatpush.msra.mxu0 %v4353_v41  ;;  %2159 = vmatpush.msra.mxu2 %v5311_v60  ;;  %v158_v41 = vld [vmem:[#allocation6 + $0x358] sm:$0xff] }
 0x127   :  { %2108 = vmatpush.msra.mxu1 %v4276_v39  ;;  %2218 = vmatpush.msra.mxu3 %v4293_v28  ;;  %v4584_v39 = vand.u32 4294901760, %v162_v10 }
 0x128   :  { %2071 = vmatpush.msra.mxu0 %v4367_v27  ;;  %2163 = vmatpush.msra.mxu2 %v5312_v57 }
 0x129   :  { %2110 = vmatpush.msra.mxu1 %v4293_v28  ;;  %2220 = vmatpush.msra.mxu3 %v4298_v2  ;;  %v5315_v28 = vand.u32 4294901760, %v4381_v25 }
 0x12a   :  { %2074 = vmatpush.msra.mxu0 %v4381_v25  ;;  %2167 = vmatpush.msra.mxu2 %v5313_v62  ;;  %v161_v25 = vld [vmem:[#allocation6 + $0x370] sm:$0xff]  ;;  %v4721_v62 = vand.u32 4294901760, %v150_v12 }
 0x12b   :  { %2112 = vmatpush.msra.mxu1 %v4298_v2  ;;  %2222 = vmatpush.msra.mxu3 %v4310_v53  ;;  %v4591_v2 = vand.u32 4294901760, %v161_v25 }
 0x12c   :  { %2077 = vmatpush.msra.mxu0 %v4393_v55  ;;  %2171 = vmatpush.msra.mxu2 %v5314_v7 }
 0x12d   :  { %2114 = vmatpush.msra.mxu1 %v4310_v53  ;;  %2224 = vmatpush.msra.mxu3 %v4327_v34  ;;  %v5317_v53 = vand.u32 4294901760, %v4405_v17  ;;  %v4611_v27 = vsub.f32 %v161_v25, %v4591_v2 }
 0x12e   :  { %2080 = vmatpush.msra.mxu0 %v4405_v17  ;;  %2175 = vmatpush.msra.mxu2 %v5315_v28  ;;  %v4725_v28 = vsub.f32 %v152_v24, %v4695_v1 }
 0x12f   :  { %2116 = vmatpush.msra.mxu1 %v4327_v34  ;;  %2226 = vmatpush.msra.mxu3 %v4342_v37  ;;  %v4598_v34 = vand.u32 4294901760, %v160_v29 }
 0x130   :  { %2083 = vmatpush.msra.mxu0 %v4418_v31  ;;  %2179 = vmatpush.msra.mxu2 %v5316_v21  ;;  %v156_v31 = vld [vmem:[#allocation6 + $0x348] sm:$0xff] }
 0x131   :  { %2118 = vmatpush.msra.mxu1 %v4342_v37  ;;  %2228 = vmatpush.msra.mxu3 %v4355_v5  ;;  %v4601_v37 = vsub.f32 %v162_v10, %v4584_v39 }
 0x132   :  { %2086 = vmatpush.msra.mxu0 %v4431_v36  ;;  %2183 = vmatpush.msra.mxu2 %v5317_v53  ;;  %v4733_v53 = vand.u32 4294901760, %v149_v0 }
 0x133   :  { %2120 = vmatpush.msra.mxu1 %v4355_v5  ;;  %2230 = vmatpush.msra.mxu3 %v4369_v51  ;;  %v4608_v5 = vand.u32 4294901760, %v159_v19  ;;  %v2293_v55 = vand.u32 4294901760, %v4601_v37 }
 0x134   :  { %2089 = vmatpush.msra.mxu0 %v4444_v52  ;;  %2187 = vmatpush.msra.mxu2 %v5318_v43  ;;  %v4737_v43 = vsub.f32 %v151_v38, %v4707_v33  ;;  %v4762_v24 = vsub.f32 %v149_v0, %v4733_v53 }
 0x135   :  { %2122 = vmatpush.msra.mxu1 %v4369_v51  ;;  %2232 = vmatpush.msra.mxu3 %v4383_v54  ;;  %v157_v51 = vld [vmem:[#allocation6 + $0x350] sm:$0xff]  ;;  %v4633_v36 = vsub.f32 %v159_v19, %v4608_v5 }
 0x136   :  { %2092 = vmatpush.msra.mxu0 %v4462_v56  ;;  %2191 = vmatpush.msra.mxu2 %v2018_v32  ;;  %v4627_v17 = vand.u32 4294901760, %v157_v51  ;;  %v155_v32 = vld [vmem:[#allocation6 + $0x340] sm:$0xff]  ;;  %v4646_v56 = vand.u32 4294901760, %v156_v31 }
 0x137   :  { %2124 = vmatpush.msra.mxu1 %v4383_v54  ;;  %2234 = vmatpush.msra.mxu3 %v4395_v20  ;;  %v4616_v54 = vand.u32 4294901760, %v158_v41  ;;  %v4659_v9 = vand.u32 4294901760, %v155_v32 }
 0x138   :  { %2095 = vmatpush.msra.mxu0 %v4475_v4  ;;  %2195 = vmatpush.msra.mxu2 %v2024_v45  ;;  %v4652_v4 = vsub.f32 %v157_v51, %v4627_v17  ;;  %v4673_v58 = vsub.f32 %v156_v31, %v4646_v56  ;;  %v5203_v31 = vand.u32 4294901760, %v4725_v28 }
 0x139   :  { %2126 = vmatpush.msra.mxu1 %v4395_v20  ;;  %2236 = vmatpush.msra.mxu3 %v4407_v11  ;;  %v4622_v20 = vsub.f32 %v160_v29, %v4598_v34  ;;  %v4639_v52 = vsub.f32 %v158_v41, %v4616_v54  ;;  %v4686_v13 = vsub.f32 %v155_v32, %v4659_v9  ;;  %v148_v29 = vld [vmem:[#allocation6 + $0x308] sm:$0xff] }
 0x13a   :  { %2098 = vmatpush.msra.mxu0 %v4489_v48  ;;  %2199 = vmatpush.msra.mxu2 %v2030_v14  ;;  %v5214_v14 = vand.u32 4294901760, %v4633_v36  ;;  %v5208_v49 = vand.u32 4294901760, %v4673_v58  ;;  %v4750_v32 = vsub.f32 %v150_v12, %v4721_v62 }
 0x13b   :  { %2128 = vmatpush.msra.mxu1 %v4407_v11  ;;  %2238 = vmatpush.msra.mxu3 %v4420_v22  ;;  %v2299_v11 = vand.u32 4294901760, %v4611_v27  ;;  %v2305_v45 = vand.u32 4294901760, %v4622_v20  ;;  %v5211_v48 = vand.u32 4294901760, %v4639_v52  ;;  %v5207_v16 = vand.u32 4294901760, %v4686_v13 }
 0x13c   :  { %2101 = vmatmul.f32.vlgmr.msra.gmra.mxu0 %v4478_v50  ;;  %2203 = vmatpush.msra.mxu2 %v2036_v47  ;;  %v4670_v47 = vand.u32 4294901760, %v154_v42  ;;  %v2312_v44 = vsub.f32 %v4633_v36, %v5214_v14  ;;  %v194_v50 = vld.sshfl [vmem:[#allocation1 + $0x30] sm:$0xff pattern:$0x73625140]  ;;  %v2330_v57 = vsub.f32 %v4673_v58, %v5208_v49 }
 0x13d   :  { %2251 = vmatpush.msrb.mxu0 %v4584_v39  ;;  %2130 = vmatpush.msra.mxu1 %v4420_v22  ;;  %v2294_v22 = vsub.f32 %v4601_v37, %v2293_v55  ;;  %v2306_v59 = vsub.f32 %v4622_v20, %v2305_v45  ;;  %v4715_v60 = vand.u32 4294901760, %v194_v50  ;;  %v2336_v10 = vsub.f32 %v4686_v13, %v5207_v16  ;;  %v170_v14 = vld [vmem:[#allocation6 + $0x3b8] sm:$0xff] }
 0x13e   :  { %2240 = vmatpush.msra.mxu3 %v4436_v35  ;;  %2207 = vmatpush.msra.mxu2 %v2042_v30  ;;  %v4683_v30 = vand.u32 4294901760, %v153_v63  ;;  %v4699_v61 = vsub.f32 %v154_v42, %v4670_v47  ;;  %v2313_v46 = vand.u32 4294901760, %v2312_v44  ;;  %v2331_v41 = vand.u32 4294901760, %v2330_v57 }
 0x13f   :  { %2253 = vmatpush.msrb.mxu0 %v4591_v2  ;;  %2132 = vmatpush.msra.mxu1 %v4436_v35  ;;  %v2300_v35 = vsub.f32 %v4611_v27, %v2299_v11  ;;  %v2295_v6 = vand.u32 4294901760, %v2294_v22  ;;  %v2307_v23 = vand.u32 4294901760, %v2306_v59  ;;  %v4742_v19 = vsub.f32 %v194_v50, %v4715_v60  ;;  %v178_v22 = vld [vmem:[#allocation6 + $0x3f8] sm:$0xff] }
 0x140   :  { %2242 = vmatpush.msra.mxu3 %v4449_v3  ;;  %2209 = vmatmul.f32.vlgmr.msra.gmra.mxu2 %v4451_v26  ;;  %v4711_v18 = vsub.f32 %v153_v63, %v4683_v30  ;;  %v5206_v7 = vand.u32 4294901760, %v4699_v61  ;;  %v4754_v42 = vand.u32 4294901760, %v148_v29  ;;  %v2337_v63 = vand.u32 4294901760, %v2336_v10  ;;  %v175_v10 = vld [vmem:[#allocation6 + $0x3e0] sm:$0xff] }
 0x141   :  { %2255 = vmatpush.msrb.mxu0 %v4598_v34  ;;  %2394 = vmatpush.msrb.mxu2 %v4601_v37  ;;  %v5202_v59 = vand.u32 4294901760, %v4737_v43  ;;  %v4767_v44 = vand.u32 4294901760, %v178_v22  ;;  %v5209_v57 = vand.u32 4294901760, %v4762_v24 }
 0x142   :  { %2134 = vmatpush.msra.mxu1 %v4449_v3  ;;  %2244 = vmatpush.msra.mxu3 %v4464_v15  ;;  %v5210_v3 = vand.u32 4294901760, %v4652_v4  ;;  %v5205_v25 = vand.u32 4294901760, %v4711_v18  ;;  %v2342_v51 = vsub.f32 %v4699_v61, %v5206_v7  ;;  %v4779_v12 = vsub.f32 %v148_v29, %v4754_v42 }
 0x143   :  { %2246 = vmatmul.f32.vlgmr.msra.gmra.mxu3 %v4451_v26  ;;  %2257 = vmatpush.msrb.mxu0 %v4608_v5  ;;  %v2301_v26 = vand.u32 4294901760, %v2300_v35  ;;  %v147_v35 = vld [vmem:[#allocation6 + $0x300] sm:$0xff]  ;;  %v2360_v0 = vsub.f32 %v4737_v43, %v5202_v59 }
 0x144   :  { %2397 = vmatpush.msrb.mxu2 %v4611_v27  ;;  %2447 = vmatpush.msrb.mxu3 %v4584_v39  ;;  %v2343_v38 = vand.u32 4294901760, %v2342_v51  ;;  %v4773_v50 = vand.u32 4294901760, %v147_v35 }
 0x145   :  { %2136 = vmatpush.msra.mxu1 %v4464_v15  ;;  %2259 = vmatpush.msrb.mxu0 %v4616_v54  ;;  %v2318_v15 = vsub.f32 %v4639_v52, %v5211_v48 }
 0x146   :  { %2140 = vmatmul.f32.vlgmr.msra.gmra.mxu1 %v1943_v8  ;;  %2400 = vmatpush.msrb.mxu2 %v4622_v20  ;;  %v2324_v8 = vsub.f32 %v4652_v4, %v5210_v3 }
 0x147   :  { %2296 = vmatpush.msrb.mxu1 %v2295_v6  ;;  %2449 = vmatpush.msrb.mxu3 %v4591_v2  ;;  %v2319_v40 = vand.u32 4294901760, %v2318_v15  ;;  %v2348_v6 = vsub.f32 %v4711_v18, %v5205_v25  ;;  %v177_v15 = vld [vmem:[#allocation6 + $0x3f0] sm:$0xff] }
 0x148   :  { %2261 = vmatpush.msrb.mxu0 %v4627_v17  ;;  %2403 = vmatpush.msrb.mxu2 %v4633_v36  ;;  %v2325_v21 = vand.u32 4294901760, %v2324_v8  ;;  %v5204_v8 = vand.u32 4294901760, %v4750_v32 }
 0x149   :  { %2302 = vmatpush.msrb.mxu1 %v2301_v26  ;;  %2451 = vmatpush.msrb.mxu3 %v4598_v34  ;;  %v5216_v26 = vand.u32 4294901760, %v4742_v19 }
 0x14a   :  { %2263 = vmatpush.msrb.mxu0 %v4646_v56  ;;  %2406 = vmatpush.msrb.mxu2 %v4639_v52 }
 0x14b   :  { %2308 = vmatpush.msrb.mxu1 %v2307_v23  ;;  %2453 = vmatpush.msrb.mxu3 %v4608_v5  ;;  %v2354_v23 = vsub.f32 %v4725_v28, %v5203_v31  ;;  %v2285_v29 = vsub.f32 %v4742_v19, %v5216_v26  ;;  %v174_v31 = vld [vmem:[#allocation6 + $0x3d8] sm:$0xff]  ;;  %v169_v26 = vld [vmem:[#allocation6 + $0x3b0] sm:$0xff] }
 0x14c   :  { %2265 = vmatpush.msrb.mxu0 %v4659_v9  ;;  %2409 = vmatpush.msrb.mxu2 %v4652_v4  ;;  %v4820_v16 = vand.u32 4294901760, %v174_v31 }
 0x14d   :  { %2314 = vmatpush.msrb.mxu1 %v2313_v46  ;;  %2455 = vmatpush.msrb.mxu3 %v4616_v54  ;;  %v176_v46 = vld [vmem:[#allocation6 + $0x3e8] sm:$0xff]  ;;  %v2355_v51 = vand.u32 4294901760, %v2354_v23  ;;  %v2361_v23 = vand.u32 4294901760, %v2360_v0  ;;  %v2286_v25 = vand.u32 4294901760, %v2285_v29 }
 0x14e   :  { %2267 = vmatpush.msrb.mxu0 %v4670_v47  ;;  %2412 = vmatpush.msrb.mxu2 %v4673_v58  ;;  %v4803_v59 = vand.u32 4294901760, %v176_v46 }
 0x14f   :  { %2320 = vmatpush.msrb.mxu1 %v2319_v40  ;;  %2457 = vmatpush.msrb.mxu3 %v4627_v17  ;;  %v2349_v40 = vand.u32 4294901760, %v2348_v6  ;;  %v4801_v6 = vsub.f32 %v147_v35, %v4773_v50  ;;  %v2372_v35 = vsub.f32 %v4762_v24, %v5209_v57 }
 0x150   :  { %2269 = vmatpush.msrb.mxu0 %v4683_v30  ;;  %2415 = vmatpush.msrb.mxu2 %v4686_v13  ;;  %v4825_v57 = vsub.f32 %v176_v46, %v4803_v59 }
 0x151   :  { %2326 = vmatpush.msrb.mxu1 %v2325_v21  ;;  %2459 = vmatpush.msrb.mxu3 %v4646_v56  ;;  %v4786_v21 = vand.u32 4294901760, %v177_v15  ;;  %v5215_v49 = vand.u32 4294901760, %v4801_v6 }
 0x152   :  { %2271 = vmatpush.msrb.mxu0 %v4695_v1  ;;  %2418 = vmatpush.msrb.mxu2 %v4699_v61 }
 0x153   :  { %2332 = vmatpush.msrb.mxu1 %v2331_v41  ;;  %2461 = vmatpush.msrb.mxu3 %v4659_v9  ;;  %v4794_v41 = vsub.f32 %v178_v22, %v4767_v44  ;;  %v5212_v22 = vand.u32 4294901760, %v4779_v12 }
 0x154   :  { %2273 = vmatpush.msrb.mxu0 %v4707_v33  ;;  %2421 = vmatpush.msrb.mxu2 %v4711_v18 }
 0x155   :  { %2338 = vmatpush.msrb.mxu1 %v2337_v63  ;;  %2463 = vmatpush.msrb.mxu3 %v4670_v47  ;;  %v2366_v63 = vsub.f32 %v4750_v32, %v5204_v8  ;;  %v4815_v8 = vsub.f32 %v177_v15, %v4786_v21  ;;  %v5213_v7 = vand.u32 4294901760, %v4794_v41  ;;  %v2378_v15 = vsub.f32 %v4779_v12, %v5212_v22 }
 0x156   :  { %2275 = vmatpush.msrb.mxu0 %v4721_v62  ;;  %2424 = vmatpush.msrb.mxu2 %v4725_v28  ;;  %v4844_v22 = vsub.f32 %v174_v31, %v4820_v16 }
 0x157   :  { %2344 = vmatpush.msrb.mxu1 %v2343_v38  ;;  %2465 = vmatpush.msrb.mxu3 %v4683_v30  ;;  %v4808_v38 = vand.u32 4294901760, %v175_v10  ;;  %v2367_v0 = vand.u32 4294901760, %v2366_v63  ;;  %v2373_v63 = vand.u32 4294901760, %v2372_v35  ;;  %v5218_v3 = vand.u32 4294901760, %v4815_v8 }
 0x158   :  { %2277 = vmatpush.msrb.mxu0 %v4733_v53  ;;  %2427 = vmatpush.msrb.mxu2 %v4737_v43  ;;  %v2635_v48 = vsub.f32 %v4794_v41, %v5213_v7  ;;  %v2379_v7 = vand.u32 4294901760, %v2378_v15 }
 0x159   :  { %2350 = vmatpush.msrb.mxu1 %v2349_v40  ;;  %2467 = vmatpush.msrb.mxu3 %v4695_v1  ;;  %v173_v40 = vld [vmem:[#allocation6 + $0x3d0] sm:$0xff]  ;;  %v4833_v29 = vsub.f32 %v175_v10, %v4808_v38  ;;  %v171_v10 = vld [vmem:[#allocation6 + $0x3c0] sm:$0xff]  ;;  %v2641_v37 = vsub.f32 %v4815_v8, %v5218_v3 }
 0x15a   :  { %2279 = vmatpush.msrb.mxu0 %v4754_v42  ;;  %2430 = vmatpush.msrb.mxu2 %v4750_v32  ;;  %v4837_v46 = vand.u32 4294901760, %v173_v40  ;;  %v2636_v15 = vand.u32 4294901760, %v2635_v48  ;;  %v5319_v48 = vand.u32 4294901760, %v4742_v19 }
 0x15b   :  { %2356 = vmatpush.msrb.mxu1 %v2355_v51  ;;  %2469 = vmatpush.msrb.mxu3 %v4707_v33  ;;  %v172_v51 = vld [vmem:[#allocation6 + $0x3c8] sm:$0xff]  ;;  %v5219_v31 = vand.u32 4294901760, %v4833_v29 }
 0x15c   :  { %2281 = vmatpush.msrb.mxu0 %v4773_v50  ;;  %2433 = vmatpush.msrb.mxu2 %v4762_v24  ;;  %v4852_v35 = vand.u32 4294901760, %v172_v51 }
 0x15d   :  { %2362 = vmatpush.msrb.mxu1 %v2361_v23  ;;  %2471 = vmatpush.msrb.mxu3 %v4721_v62  ;;  %v2384_v23 = vsub.f32 %v4801_v6, %v5215_v49  ;;  %v5220_v49 = vand.u32 4294901760, %v4844_v22  ;;  %v2653_v20 = vsub.f32 %v4833_v29, %v5219_v31 }
 0x15e   :  { %2287 = vmatmul.f32.vlgmr.msrb.gmra.mxu0 %v2286_v25  ;;  %2436 = vmatpush.msrb.mxu2 %v4779_v12  ;;  %v5217_v25 = vand.u32 4294901760, %v4825_v57 }
 0x15f   :  { %2488 = vmatpush.msra.mxu0 %v2293_v55  ;;  %2368 = vmatpush.msrb.mxu1 %v2367_v0  ;;  %v4863_v55 = vsub.f32 %v173_v40, %v4837_v46  ;;  %v4865_v0 = vand.u32 4294901760, %v171_v10  ;;  %v2385_v27 = vand.u32 4294901760, %v2384_v23  ;;  %v4877_v40 = vsub.f32 %v172_v51, %v4852_v35  ;;  %v166_v51 = vld [vmem:[#allocation6 + $0x398] sm:$0xff] }
 0x160   :  { %2473 = vmatpush.msrb.mxu3 %v4733_v53  ;;  %2439 = vmatpush.msrb.mxu2 %v4801_v6  ;;  %v5320_v23 = vand.u32 4294901760, %v4633_v36  ;;  %v2659_v31 = vsub.f32 %v4844_v22, %v5220_v49  ;;  %v5321_v36 = vand.u32 4294901760, %v4639_v52  ;;  %v5323_v49 = vand.u32 4294901760, %v4652_v4 }
 0x161   :  { %2492 = vmatpush.msra.mxu0 %v2299_v11  ;;  %2374 = vmatpush.msrb.mxu1 %v2373_v63  ;;  %v2647_v11 = vsub.f32 %v4825_v57, %v5217_v25  ;;  %v4879_v63 = vand.u32 4294901760, %v170_v14  ;;  %v2642_v25 = vand.u32 4294901760, %v2641_v37  ;;  %v4891_v3 = vsub.f32 %v171_v10, %v4865_v0 }
 0x162   :  { %2475 = vmatpush.msrb.mxu3 %v4754_v42  ;;  %2442 = vmatmul.f32.vlgmr.msrb.gmra.mxu2 %v4742_v19  ;;  %v167_v19 = vld [vmem:[#allocation6 + $0x3a0] sm:$0xff]  ;;  %v5322_v52 = vand.u32 4294901760, %v4863_v55  ;;  %v5324_v4 = vand.u32 4294901760, %v4673_v58  ;;  %v5326_v58 = vand.u32 4294901760, %v4686_v13  ;;  %v5328_v13 = vand.u32 4294901760, %v4699_v61 }
 0x163   :  { %2496 = vmatpush.msra.mxu0 %v2305_v45  ;;  %2592 = vmatpush.msra.mxu2 %v4767_v44  ;;  %v168_v45 = vld [vmem:[#allocation6 + $0x3a8] sm:$0xff]  ;;  %v2648_v37 = vand.u32 4294901760, %v2647_v11  ;;  %v4903_v10 = vsub.f32 %v170_v14, %v4879_v63  ;;  %v165_v11 = vld [vmem:[#allocation6 + $0x390] sm:$0xff] }
 0x164   :  { %2380 = vmatpush.msrb.mxu1 %v2379_v7  ;;  %2477 = vmatpush.msrb.mxu3 %v4773_v50  ;;  %v4893_v7 = vand.u32 4294901760, %v169_v26 }
 0x165   :  { %2481 = vmatmul.f32.vlgmr.msrb.gmra.mxu3 %v5319_v48  ;;  %2500 = vmatpush.msra.mxu0 %v5320_v23  ;;  %v5221_v48 = vand.u32 4294901760, %v4877_v40  ;;  %v4905_v23 = vand.u32 4294901760, %v168_v45 }
 0x166   :  { %2594 = vmatpush.msra.mxu2 %v4786_v21  ;;  %2637 = vmatpush.msra.mxu3 %v2636_v15  ;;  %v2654_v15 = vand.u32 4294901760, %v2653_v20  ;;  %v4915_v14 = vsub.f32 %v169_v26, %v4893_v7  ;;  %v2660_v20 = vand.u32 4294901760, %v2659_v31 }
 0x167   :  { %2386 = vmatpush.msrb.mxu1 %v2385_v27  ;;  %2504 = vmatpush.msra.mxu0 %v5321_v36  ;;  %v2665_v27 = vsub.f32 %v4863_v55, %v5322_v52  ;;  %v4917_v36 = vand.u32 4294901760, %v167_v19  ;;  %v4928_v26 = vsub.f32 %v168_v45, %v4905_v23  ;;  %v4930_v52 = vand.u32 4294901760, %v166_v51 }
 0x168   :  { %2388 = vmatmul.f32.vlgmr.msrb.gmra.mxu1 %v4715_v60  ;;  %2596 = vmatpush.msra.mxu2 %v4803_v59 }
 0x169   :  { %2555 = vmatpush.msra.mxu1 %v4584_v39  ;;  %2643 = vmatpush.msra.mxu3 %v2642_v25  ;;  %v2671_v39 = vsub.f32 %v4877_v40, %v5221_v48  ;;  %v4941_v45 = vsub.f32 %v167_v19, %v4917_v36  ;;  %v164_v48 = vld [vmem:[#allocation6 + $0x388] sm:$0xff]  ;;  %v195_v25 = vld.sshfl [vmem:[#allocation1 + $0x38] sm:$0xff pattern:$0x73625140]  ;;  %v5330_v19 = vand.u32 4294901760, %v4711_v18  ;;  %v5332_v18 = vand.u32 4294901760, %v4725_v28 }
 0x16a   :  { %2508 = vmatpush.msra.mxu0 %v5323_v49  ;;  %2598 = vmatpush.msra.mxu2 %v4808_v38  ;;  %v5325_v49 = vand.u32 4294901760, %v4891_v3 }
 0x16b   :  { %2557 = vmatpush.msra.mxu1 %v4591_v2  ;;  %2649 = vmatpush.msra.mxu3 %v2648_v37  ;;  %v2666_v2 = vand.u32 4294901760, %v2665_v27  ;;  %v163_v37 = vld [vmem:[#allocation6 + $0x380] sm:$0xff] }
 0x16c   :  { %2512 = vmatpush.msra.mxu0 %v5324_v4  ;;  %2600 = vmatpush.msra.mxu2 %v4820_v16  ;;  %v2677_v31 = vsub.f32 %v4891_v3, %v5325_v49  ;;  %v4946_v4 = vand.u32 4294901760, %v165_v11  ;;  %v4954_v49 = vsub.f32 %v166_v51, %v4930_v52  ;;  %v2700_v51 = vand.u32 4294901760, %v4941_v45 }
 0x16d   :  { %2559 = vmatpush.msra.mxu1 %v4598_v34  ;;  %2655 = vmatpush.msra.mxu3 %v2654_v15  ;;  %v2672_v34 = vand.u32 4294901760, %v2671_v39  ;;  %v5327_v15 = vand.u32 4294901760, %v4903_v10  ;;  %v5329_v39 = vand.u32 4294901760, %v4915_v14 }
 0x16e   :  { %2516 = vmatpush.msra.mxu0 %v5326_v58  ;;  %2602 = vmatpush.msra.mxu2 %v4837_v46  ;;  %v4959_v58 = vand.u32 4294901760, %v164_v48  ;;  %v4972_v61 = vsub.f32 %v165_v11, %v4946_v4 }
 0x16f   :  { %2561 = vmatpush.msra.mxu1 %v4608_v5  ;;  %2661 = vmatpush.msra.mxu3 %v2660_v20  ;;  %v2683_v27 = vsub.f32 %v4903_v10, %v5327_v15  ;;  %v4961_v5 = vand.u32 4294901760, %v195_v25  ;;  %v2678_v20 = vand.u32 4294901760, %v2677_v31  ;;  %v2689_v15 = vsub.f32 %v4915_v14, %v5329_v39 }
 0x170   :  { %2520 = vmatpush.msra.mxu0 %v5328_v13  ;;  %2604 = vmatpush.msra.mxu2 %v4852_v35  ;;  %v4974_v13 = vand.u32 4294901760, %v163_v37  ;;  %v2706_v39 = vand.u32 4294901760, %v4954_v49  ;;  %v4985_v11 = vsub.f32 %v164_v48, %v4959_v58  ;;  %v2712_v28 = vand.u32 4294901760, %v4972_v61 }
 0x171   :  { %2563 = vmatpush.msra.mxu1 %v4616_v54  ;;  %2667 = vmatpush.msra.mxu3 %v2666_v2  ;;  %v2684_v54 = vand.u32 4294901760, %v2683_v27  ;;  %v5331_v2 = vand.u32 4294901760, %v4928_v26  ;;  %v5333_v27 = vand.u32 4294901760, %v4737_v43 }
 0x172   :  { %2524 = vmatpush.msra.mxu0 %v5330_v19  ;;  %2606 = vmatpush.msra.mxu2 %v4865_v0  ;;  %v4988_v19 = vsub.f32 %v195_v25, %v4961_v5  ;;  %v4999_v48 = vsub.f32 %v163_v37, %v4974_v13  ;;  %v2707_v25 = vsub.f32 %v4954_v49, %v2706_v39  ;;  %v2718_v43 = vand.u32 4294901760, %v4985_v11 }
 0x173   :  { %2565 = vmatpush.msra.mxu1 %v4627_v17  ;;  %2673 = vmatpush.msra.mxu3 %v2672_v34  ;;  %v2695_v31 = vsub.f32 %v4928_v26, %v5331_v2  ;;  %v2690_v17 = vand.u32 4294901760, %v2689_v15  ;;  %v2701_v34 = vsub.f32 %v4941_v45, %v2700_v51 }
 0x174   :  { %2528 = vmatpush.msra.mxu0 %v5332_v18  ;;  %2608 = vmatpush.msra.mxu2 %v4879_v63  ;;  %v2625_v15 = vand.u32 4294901760, %v4988_v19  ;;  %v2708_v2 = vand.u32 4294901760, %v2707_v25 }
 0x175   :  { %2567 = vmatpush.msra.mxu1 %v4646_v56  ;;  %2679 = vmatpush.msra.mxu3 %v2678_v20  ;;  %v2696_v56 = vand.u32 4294901760, %v2695_v31  ;;  %v5334_v20 = vand.u32 4294901760, %v4750_v32  ;;  %v2702_v37 = vand.u32 4294901760, %v2701_v34  ;;  %v2713_v32 = vsub.f32 %v4972_v61, %v2712_v28 }
 0x176   :  { %2532 = vmatpush.msra.mxu0 %v5333_v27  ;;  %2610 = vmatpush.msra.mxu2 %v4893_v7  ;;  %v5336_v31 = vand.u32 4294901760, %v4779_v12  ;;  %v2933_v34 = vstv %s5139_s0 }
 0x177   :  { %2569 = vmatpush.msra.mxu1 %v4659_v9  ;;  %2685 = vmatpush.msra.mxu3 %v2684_v54  ;;  %v5335_v9 = vand.u32 4294901760, %v4762_v24  ;;  %v2724_v54 = vand.u32 4294901760, %v4999_v48  ;;  %v2626_v24 = vsub.f32 %v4988_v19, %v2625_v15  ;;  %v2714_v12 = vand.u32 4294901760, %v2713_v32 }
 0x178   :  { %2536 = vmatpush.msra.mxu0 %v5334_v20  ;;  %2612 = vmatpush.msra.mxu2 %v4905_v23  ;;  %2978 = vrcp.f32 %v2933_v34  ;;  %vm2939_vm0 = vweird.f32 %v2933_v34  ;;  %v2943_v32 = vand.u32 2147483647, %v2933_v34 }
 0x179   :  { %2571 = vmatpush.msra.mxu1 %v4670_v47  ;;  %2691 = vmatpush.msra.mxu3 %v2690_v17  ;;  %v2719_v47 = vsub.f32 %v4985_v11, %v2718_v43  ;;  %v2725_v18 = vsub.f32 %v4999_v48, %v2724_v54 }
 0x17a   :  { %2540 = vmatpush.msra.mxu0 %v5335_v9  ;;  %2614 = vmatpush.msra.mxu2 %v4917_v36  ;;  %vm2944_vm3 = vcmp.eq.f32.partialorder %v2943_v32, 8.507059e+37 }
 0x17b   :  { %2573 = vmatpush.msra.mxu1 %v4683_v30  ;;  %2697 = vmatpush.msra.mxu3 %v2696_v56  ;;  %v5337_v30 = vand.u32 4294901760, %v4801_v6  ;;  %v2720_v17 = vand.u32 4294901760, %v2719_v47  ;;  %v2726_v6 = vand.u32 4294901760, %v2725_v18 }
 0x17c   :  { %2544 = vmatpush.msra.mxu0 %v5336_v31  ;;  %2616 = vmatpush.msra.mxu2 %v4930_v52 }
 0x17d   :  { %2575 = vmatpush.msra.mxu1 %v4695_v1  ;;  %2703 = vmatpush.msra.mxu3 %v2702_v37  ;;  %v2627_v1 = vand.u32 4294901760, %v2626_v24  ;;  %v2945_v37 = vand.u32 2147483648, %v2933_v34 }
 0x17e   :  { %2548 = vmatpush.msra.mxu0 %v5337_v30  ;;  %2618 = vmatpush.msra.mxu2 %v4946_v4  ;;  %v2979_v56 = vpop.eup %2978 }
 0x17f   :  { %2577 = vmatpush.msra.mxu1 %v4707_v33  ;;  %2709 = vmatpush.msra.mxu3 %v2708_v2  ;;  %v5338_v33 = vand.u32 4294901760, %v4794_v41  ;;  %vm2940_vm1 = vweird.f32 %v2979_v56  ;;  %v2946_v47 = vor.u32 1.1754944e-38, %v2945_v37 }
 0x180   :  { %2550 = vmatmul.f32.vlgmr.msra.gmra.mxu0 %v4715_v60  ;;  %2620 = vmatpush.msra.mxu2 %v4959_v58  ;;  %vm2941_vm2 = vmor %vm2939_vm0, %vm2940_vm1 }
 0x181   :  { %2735 = vmatpush.msrb.mxu0 %v4794_v41  ;;  %2579 = vmatpush.msra.mxu1 %v4721_v62  ;;  %v5339_v62 = vand.u32 4294901760, %v4815_v8 }
 0x182   :  { %2715 = vmatpush.msra.mxu3 %v2714_v12  ;;  %2622 = vmatpush.msra.mxu2 %v4974_v13 }
 0x183   :  { %2738 = vmatpush.msrb.mxu0 %v4815_v8  ;;  %2581 = vmatpush.msra.mxu1 %v4733_v53  ;;  %v5340_v53 = vand.u32 4294901760, %v4825_v57  ;;  %v5346_v8 = vand.u32 4294901760, %v4903_v10 }
 0x184   :  { %2721 = vmatpush.msra.mxu3 %v2720_v17  ;;  %2628 = vmatmul.f32.vlgmr.msra.gmra.mxu2 %v2627_v1 }
 0x185   :  { %2741 = vmatpush.msrb.mxu0 %v4825_v57  ;;  %2829 = vmatpush.msrb.mxu2 %v5338_v33  ;;  %v242_v57 = vpop.f32.mrf.mxu0 }
 0x186   :  { %2583 = vmatpush.msra.mxu1 %v4754_v42  ;;  %2727 = vmatpush.msra.mxu3 %v2726_v6  ;;  %v5341_v42 = vand.u32 4294901760, %v4833_v29 }
 0x187   :  { %2729 = vmatmul.f32.vlgmr.msra.gmra.mxu3 %v4961_v5  ;;  %2744 = vmatpush.msrb.mxu0 %v4833_v29  ;;  %v397_v29 = vpop.f32.mrf.mxu2 }
 0x188   :  { %2833 = vmatpush.msrb.mxu2 %v5339_v62  ;;  %2896 = vmatpush.msrb.mxu3 %v4767_v44 }
 0x189   :  { %2585 = vmatpush.msra.mxu1 %v4773_v50  ;;  %2747 = vmatpush.msrb.mxu0 %v4844_v22  ;;  %v5344_v50 = vand.u32 4294901760, %v4877_v40 }
 0x18a   :  { %2587 = vmatmul.f32.vlgmr.msra.gmra.mxu1 %v4715_v60  ;;  %2837 = vmatpush.msrb.mxu2 %v5340_v53  ;;  %v5342_v60 = vand.u32 4294901760, %v4844_v22  ;;  %v343_v22 = vpop.f32.mrf.mxu1 }
 0x18b   :  { %2788 = vmatpush.msrb.mxu1 %v4767_v44  ;;  %2898 = vmatpush.msrb.mxu3 %v4786_v21  ;;  %v5343_v44 = vand.u32 4294901760, %v4863_v55 }
 0x18c   :  { %2750 = vmatpush.msrb.mxu0 %v4863_v55  ;;  %2841 = vmatpush.msrb.mxu2 %v5341_v42 }
 0x18d   :  { %2790 = vmatpush.msrb.mxu1 %v4786_v21  ;;  %2900 = vmatpush.msrb.mxu3 %v4803_v59  ;;  %v5348_v21 = vand.u32 4294901760, %v4928_v26 }
 0x18e   :  { %2753 = vmatpush.msrb.mxu0 %v4877_v40  ;;  %2845 = vmatpush.msrb.mxu2 %v5342_v60 }
 0x18f   :  { %2792 = vmatpush.msrb.mxu1 %v4803_v59  ;;  %2902 = vmatpush.msrb.mxu3 %v4808_v38  ;;  %v5345_v59 = vand.u32 4294901760, %v4891_v3 }
 0x190   :  { %2756 = vmatpush.msrb.mxu0 %v4891_v3  ;;  %2849 = vmatpush.msrb.mxu2 %v5343_v44  ;;  %v5347_v3 = vand.u32 4294901760, %v4915_v14 }
 0x191   :  { %2794 = vmatpush.msrb.mxu1 %v4808_v38  ;;  %2904 = vmatpush.msrb.mxu3 %v4820_v16 }
 0x192   :  { %2759 = vmatpush.msrb.mxu0 %v4903_v10  ;;  %2853 = vmatpush.msrb.mxu2 %v5344_v50  ;;  %v583_v10 = vpop.f32.mrf.mxu2 }
 0x193   :  { %2796 = vmatpush.msrb.mxu1 %v4820_v16  ;;  %2906 = vmatpush.msrb.mxu3 %v4837_v46  ;;  %v2977_v16 = vld [vmem:[%s5142_s3] ss:$0 sm:$0xff] }
 0x194   :  { %2762 = vmatpush.msrb.mxu0 %v4915_v14  ;;  %2857 = vmatpush.msrb.mxu2 %v5345_v59  ;;  %v243_v41 = vadd.f32 %v2977_v16, %v242_v57 }
 0x195   :  { %2798 = vmatpush.msrb.mxu1 %v4837_v46  ;;  %2908 = vmatpush.msrb.mxu3 %v4852_v35 }
 0x196   :  { %2765 = vmatpush.msrb.mxu0 %v4928_v26  ;;  %2861 = vmatpush.msrb.mxu2 %v5346_v8  ;;  %v344_v38 = vadd.f32 %v343_v22, %v243_v41 }
 0x197   :  { %2800 = vmatpush.msrb.mxu1 %v4852_v35  ;;  %2910 = vmatpush.msrb.mxu3 %v4865_v0  ;;  %v436_v35 = vpop.f32.mrf.mxu3 }
 0x198   :  { %2768 = vmatpush.msrb.mxu0 %v4941_v45  ;;  %2865 = vmatpush.msrb.mxu2 %v5347_v3  ;;  %v398_v46 = vadd.f32 %v397_v29, %v344_v38 }
 0x199   :  { %2802 = vmatpush.msrb.mxu1 %v4865_v0  ;;  %2912 = vmatpush.msrb.mxu3 %v4879_v63  ;;  %v505_v0 = vpop.f32.mrf.mxu0 }
 0x19a   :  { %2771 = vmatpush.msrb.mxu0 %v4954_v49  ;;  %2869 = vmatpush.msrb.mxu2 %v5348_v21  ;;  %v437_v55 = vadd.f32 %v436_v35, %v398_v46  ;;  %v846_v49 = vpop.f32.mrf.mxu2 }
 0x19b   :  { %2804 = vmatpush.msrb.mxu1 %v4879_v63  ;;  %2914 = vmatpush.msrb.mxu3 %v4893_v7  ;;  %v542_v63 = vpop.f32.mrf.mxu1 }
 0x19c   :  { %2774 = vmatpush.msrb.mxu0 %v4972_v61  ;;  %2873 = vmatpush.msrb.mxu2 %v2700_v51  ;;  %v506_v40 = vadd.f32 %v505_v0, %v437_v55 }
 0x19d   :  { %2806 = vmatpush.msrb.mxu1 %v4893_v7  ;;  %2916 = vmatpush.msrb.mxu3 %v4905_v23 }
 0x19e   :  { %2777 = vmatpush.msrb.mxu0 %v4985_v11  ;;  %2877 = vmatpush.msrb.mxu2 %v2706_v39  ;;  %v543_v7 = vadd.f32 %v542_v63, %v506_v40 }
 0x19f   :  { %2808 = vmatpush.msrb.mxu1 %v4905_v23  ;;  %2918 = vmatpush.msrb.mxu3 %v4917_v36  ;;  %v684_v14 = vpop.f32.mrf.mxu3 }
 0x1a0   :  { %2780 = vmatpush.msrb.mxu0 %v4999_v48  ;;  %2881 = vmatpush.msrb.mxu2 %v2712_v28  ;;  %v584_v23 = vadd.f32 %v583_v10, %v543_v7 }
 0x1a1   :  { %2810 = vmatpush.msrb.mxu1 %v4917_v36  ;;  %2920 = vmatpush.msrb.mxu3 %v4930_v52  ;;  %v738_v36 = vpop.f32.mrf.mxu0 }
 0x1a2   :  { %2783 = vmatmul.f32.vlgmr.msrb.gmra.mxu0 %v4988_v19  ;;  %2885 = vmatpush.msrb.mxu2 %v2718_v43  ;;  %v685_v26 = vadd.f32 %v684_v14, %v584_v23  ;;  %v1079_v19 = vpop.f32.mrf.mxu2  ;;  %v2935_v43 = vmul.f32 %v2979_v56, %v2933_v34 }
 0x1a3   :  { %2812 = vmatpush.msrb.mxu1 %v4930_v52  ;;  %2922 = vmatpush.msrb.mxu3 %v4946_v4  ;;  %v777_v52 = vpop.f32.mrf.mxu1 }
 0x1a4   :  { %2889 = vmatpush.msrb.mxu2 %v2724_v54  ;;  %v739_v45 = vadd.f32 %v738_v36, %v685_v26  ;;  %v2936_v9 = vsub.f32 1.0, %v2935_v43 }
 0x1a5   :  { %2814 = vmatpush.msrb.mxu1 %v4946_v4  ;;  %2924 = vmatpush.msrb.mxu3 %v4959_v58 }
 0x1a6   :  { %2891 = vmatmul.f32.vlgmr.msrb.gmra.mxu2 %v4961_v5  ;;  %v778_v4 = vadd.f32 %v777_v52, %v739_v45  ;;  %v2937_v31 = vmul.f32 %v2979_v56, %v2936_v9 }
 0x1a7   :  { %2816 = vmatpush.msrb.mxu1 %v4959_v58  ;;  %2926 = vmatpush.msrb.mxu3 %v4974_v13 }
 0x1a8   :  { %2928 = vmatmul.f32.vlgmr.msrb.gmra.mxu3 %v4961_v5  ;;  %v847_v58 = vadd.f32 %v846_v49, %v778_v4  ;;  %v883_v5 = vpop.f32.mrf.mxu3  ;;  %v2938_v24 = vadd.f32 %v2979_v56, %v2937_v31 }
 0x1a9   :  { %2818 = vmatpush.msrb.mxu1 %v4974_v13  ;;  %v924_v51 = vpop.f32.mrf.mxu0 }
 0x1aa   :  { %2822 = vmatmul.f32.vlgmr.msrb.gmra.mxu1 %v2625_v15  ;;  %v884_v61 = vadd.f32 %v883_v5, %v847_v58  ;;  %v1265_v2 = vpop.f32.mrf.mxu2  ;;  %v2942_v18 = vsel %vm2941_vm2, %v2979_v56, %v2938_v24 }
 0x1ab   :  { %v1025_v13 = vpop.f32.mrf.mxu1  ;;  %v2947_v17 = vsel %vm2944_vm3, %v2946_v47, %v2942_v18 }
 0x1ac   :  { %v925_v39 = vadd.f32 %v924_v51, %v884_v61  ;;  %2970 = vpush %v2947_v17 }
 0x1ae   :  { %v1026_v11 = vadd.f32 %v1025_v13, %v925_v39 }
 0x1b0   :  { %v1080_v27 = vadd.f32 %v1079_v19, %v1026_v11  ;;  %v1118_v28 = vpop.f32.mrf.mxu3 }
 0x1b1   :  { %v1187_v48 = vpop.f32.mrf.mxu0 }
 0x1b2   :  { %v1119_v25 = vadd.f32 %v1118_v28, %v1080_v27  ;;  %v1528_v42 = vpop.f32.mrf.mxu2 }
 0x1b3   :  { %v1224_v20 = vpop.f32.mrf.mxu1 }
 0x1b4   :  { %v1188_v15 = vadd.f32 %v1187_v48, %v1119_v25 }
 0x1b6   :  { %v1225_v54 = vadd.f32 %v1224_v20, %v1188_v15 }
 0x1b8   :  { %v1266_v30 = vadd.f32 %v1265_v2, %v1225_v54  ;;  %v1366_v12 = vpop.f32.mrf.mxu3 }
 0x1b9   :  { %v1420_v1 = vpop.f32.mrf.mxu0 }
 0x1ba   :  { %v1367_v6 = vadd.f32 %v1366_v12, %v1266_v30  ;;  %v1761_v57 = vpop.f32.mrf.mxu2 }
 0x1bb   :  { %v1459_v33 = vpop.f32.mrf.mxu1 }
 0x1bc   :  { %v1421_v62 = vadd.f32 %v1420_v1, %v1367_v6 }
 0x1be   :  { %v1460_v53 = vadd.f32 %v1459_v33, %v1421_v62 }
 0x1c0   :  { %v1529_v60 = vadd.f32 %v1528_v42, %v1460_v53  ;;  %v1565_v44 = vpop.f32.mrf.mxu3 }
 0x1c1   :  { %v1606_v50 = vpop.f32.mrf.mxu0 }
 0x1c2   :  { %v1566_v59 = vadd.f32 %v1565_v44, %v1529_v60  ;;  %v1947_v55 = vpop.f32.mrf.mxu2 }
 0x1c3   :  { %v1707_v8 = vpop.f32.mrf.mxu1 }
 0x1c4   :  { %v1607_v16 = vadd.f32 %v1606_v50, %v1566_v59 }
 0x1c6   :  { %v1708_v3 = vadd.f32 %v1707_v8, %v1607_v16 }
 0x1c8   :  { %v1762_v21 = vadd.f32 %v1761_v57, %v1708_v3  ;;  %v1800_v41 = vpop.f32.mrf.mxu3 }
 0x1c9   :  { %v1869_v22 = vpop.f32.mrf.mxu0 }
 0x1ca   :  { %v1801_v38 = vadd.f32 %v1800_v41, %v1762_v21  ;;  %v2210_v36 = vpop.f32.mrf.mxu2 }
 0x1cb   :  { %v1906_v29 = vpop.f32.mrf.mxu1 }
 0x1cc   :  { %v1870_v46 = vadd.f32 %v1869_v22, %v1801_v38 }
 0x1ce   :  { %v1907_v35 = vadd.f32 %v1906_v29, %v1870_v46 }
 0x1d0   :  { %v1948_v0 = vadd.f32 %v1947_v55, %v1907_v35  ;;  %v2048_v40 = vpop.f32.mrf.mxu3 }
 0x1d1   :  { %v2102_v63 = vpop.f32.mrf.mxu0 }
 0x1d2   :  { %v2049_v7 = vadd.f32 %v2048_v40, %v1948_v0 }
 0x1d3   :  { %v2141_v10 = vpop.f32.mrf.mxu1 }
 0x1d4   :  { %v2103_v23 = vadd.f32 %v2102_v63, %v2049_v7 }
 0x1d6   :  { %v2142_v14 = vadd.f32 %v2141_v10, %v2103_v23 }
 0x1d8   :  { %v2211_v26 = vadd.f32 %v2210_v36, %v2142_v14  ;;  %v2247_v52 = vpop.f32.mrf.mxu3 }
 0x1da   :  { %v2248_v4 = vadd.f32 %v2247_v52, %v2211_v26 }
 0x1db   :  { %v2288_v45 = vpop.f32.mrf.mxu0 }
 0x1dc   :  { %v2289_v58 = vadd.f32 %v2288_v45, %v2248_v4 }
 0x1dd   :  { %s2971_s0 = spop %2970 }
 0x1de   :  { %v2949_v2 = vstv %s2971_s0 }
 0x1e5   :  { %v2389_v49 = vpop.f32.mrf.mxu1  ;;  %v2443_v51 = vpop.f32.mrf.mxu2 }
 0x1e6   :  { %v2390_v5 = vadd.f32 %v2389_v49, %v2289_v58 }
 0x1e8   :  { %v2444_v61 = vadd.f32 %v2443_v51, %v2390_v5  ;;  %v2482_v13 = vpop.f32.mrf.mxu3 }
 0x1ea   :  { %v2483_v11 = vadd.f32 %v2482_v13, %v2444_v61 }
 0x1fd   :  { %v2551_v39 = vpop.f32.mrf.mxu0 }
 0x1fe   :  { %v2552_v34 = vadd.f32 %v2551_v39, %v2483_v11 }
 0x207   :  { %v2588_v19 = vpop.f32.mrf.mxu1  ;;  %v2629_v28 = vpop.f32.mrf.mxu2 }
 0x208   :  { %v2589_v27 = vadd.f32 %v2588_v19, %v2552_v34 }
 0x20a   :  { %v2630_v48 = vadd.f32 %v2629_v28, %v2589_v27  ;;  %v2730_v56 = vpop.f32.mrf.mxu3 }
 0x20c   :  { %v2731_v20 = vadd.f32 %v2730_v56, %v2630_v48 }
 0x21f   :  { %v2784_v25 = vpop.f32.mrf.mxu0 }
 0x220   :  { %v2785_v43 = vadd.f32 %v2784_v25, %v2731_v20 }
 0x227   :  { %v2823_v15 = vpop.f32.mrf.mxu1 }
 0x228   :  { %v2824_v37 = vadd.f32 %v2823_v15, %v2785_v43 }
 0x229   :  { %v2892_v9 = vpop.f32.mrf.mxu2 }
 0x22a   :  { %v2893_v32 = vadd.f32 %v2892_v9, %v2824_v37 }
 0x22b   :  { %v2929_v54 = vpop.f32.mrf.mxu3 }
 0x22c   :  { %v2930_v31 = vadd.f32 %v2929_v54, %v2893_v32 }
 0x22e   :  { %v2950_v47 = vmul.f32 %v2949_v2, %v2930_v31 }
 0x230   :  { %2951 = vst [vmem:[#allocation8] sm:$0x3] %v2950_v47 }
 0x231   :  { %2962 = dma.vmem_to_hbm [thread:$0]  %s2958_s29, 32, %s2960_s6, [#allocation5]  }
 0x232   :  { %3056 = dma.done.wait [#allocation5], 32  }
 0x233   :  { %3057 = vsyncadd [#allocation5], 4294967264 }
 0x234   :  { %2967 = vsyncpa [#allocation4], 1 }
 0x235   :  { %2968 = vsyncpa [#allocation7], 1 }
 0x236   :  { %2969 = vsyncpa [#allocation5], 1 }

</bundles_post_ra>
